<compile_context>
chip_gen: v5e
topology: v5e:2x2
jax: 0.10.0
libtpu: 0.0.40
codegen_flags: <defaults>
</compile_context>

<pallas_src>
import jax
import jax.numpy as jnp
from jax.experimental import pallas as pl
from jax.experimental.pallas import tpu as pltpu


# ---------------- Pallas kernel ---------------------------------------------
def classifier_kernel(x_ref, w_ref, b_ref, o_ref):
    # x_ref: (Nt, CS)   flattened channel*spatial features (lane-dense)
    # w_ref: (CS, Kp)   mean-folded fc weight (grid-invariant, 1/S pre-applied)
    # b_ref: (1,  Kp)   fc bias (grid-invariant, zero-padded)
    # o_ref: (Nt, Kp)   logits (lane-dense, padded class dim)
    o_ref[...] = (
        jnp.dot(x_ref[...], w_ref[...], preferred_element_type=jnp.float32)
        + b_ref[...]
    )


# ---------------- helpers -----------------------------------------------------
def _round_up(x, m):
    return ((x + m - 1) // m) * m


_VMEM_BUDGET = 40 * 1024 * 1024      # working-set budget; fits every generation
_MAX_ROW_TILE = 512                  # rows per grid step upper bound


def _plan_tiles(n, cs, kp):
    """Pick rows-per-grid-step and the padded batch size under a VMEM budget.

    Returns (n_tile, n_padded, vmem_bytes_needed)."""
    cs_pad = _round_up(cs, 128)                         # lane padding of input tile
    fixed = 2 * cs_pad * kp * 4 + 2 * 8 * kp * 4        # weight + bias (x2 buffers)

    def tile_bytes(nt):
        return 2 * nt * cs_pad * 4 + 2 * nt * kp * 4    # input + output (x2 buffers)

    nt_max = _MAX_ROW_TILE
    while nt_max > 8 and fixed + tile_bytes(nt_max) > _VMEM_BUDGET:
        nt_max -= 8

    n8 = _round_up(max(n, 1), 8)
    if n8 <= nt_max:                                    # tiny batch: one grid step
        return n8, n8, fixed + tile_bytes(n8)

    steps = pl.cdiv(n8, nt_max)
    if steps % 2:
        steps += 1                                      # even grid -> both TensorCores
    nt = _round_up(pl.cdiv(n8, steps), 8)
    return nt, nt * steps, fixed + tile_bytes(nt)


def _prepare_params(fc_weight, fc_bias, spatial):
    """Fold the spatial mean into the fc weight and lane-pad the class dim.

    w_big[c*S + s, k] = fc_weight[k, c] / S.  Pure fixed preprocessing; cache
    the result (or jit the caller so XLA hoists it) across inference calls."""
    k, c = fc_weight.shape
    kp = 128 * pl.cdiv(k, 128)
    w_t = fc_weight.astype(jnp.float32).T * (1.0 / float(spatial))    # (C, K)
    w_big = jnp.repeat(w_t, spatial, axis=0)                          # (C*S, K)
    w_pad = jnp.zeros((c * spatial, kp), jnp.float32).at[:, :k].set(w_big)
    b_pad = jnp.zeros((1, kp), jnp.float32).at[0, :k].set(fc_bias.astype(jnp.float32))
    return w_pad, b_pad


# ---------------- wrapper ----------------------------------------------------
def classifier_forward(video_feat, fc_weight, fc_bias):
    """video_feat: (N, C, H, W) NCHW; fc_weight: (K, C) (PyTorch Linear layout);
    fc_bias: (K,).  Returns logits: (N, K) in float32."""
    n, c, h, w = video_feat.shape
    k = fc_weight.shape[0]
    s = h * w
    cs = c * s

    w_pad, b_pad = _prepare_params(fc_weight, fc_bias, s)
    kp = w_pad.shape[1]

    # Pure reshape of contiguous NCHW: (N, C, H, W) -> (N, C*H*W), lane-dense.
    x2 = video_feat.astype(jnp.float32).reshape(n, cs)

    nt, n_pad, vmem_need = _plan_tiles(n, cs, kp)
    if n_pad != n:
        x2 = jnp.pad(x2, ((0, n_pad - n), (0, 0)))      # zero rows, sliced off below
    grid = (n_pad // nt,)

    # Explicit scoped-VMEM limit sized from the actual buffers (never below the
    # 32 MiB default, never above 48 MiB so it stays safe on v7x's 64 MiB).
    vmem_limit = min(48 * 1024 * 1024,
                     max(32 * 1024 * 1024, int(vmem_need) + 8 * 1024 * 1024))

    out = pl.pallas_call(
        classifier_kernel,
        out_shape=jax.ShapeDtypeStruct((n_pad, kp), jnp.float32),
        grid_spec=pltpu.PrefetchScalarGridSpec(
            num_scalar_prefetch=0,
            grid=grid,
            in_specs=[
                pl.BlockSpec((nt, cs), lambda i: (i, 0)),    # input row tile
                pl.BlockSpec((cs, kp), lambda i: (0, 0)),    # weight (grid-invariant)
                pl.BlockSpec((1, kp), lambda i: (0, 0)),     # bias   (grid-invariant)
            ],
            out_specs=pl.BlockSpec((nt, kp), lambda i: (i, 0)),
        ),
        compiler_params=pltpu.CompilerParams(
            dimension_semantics=("parallel",),
            vmem_limit_bytes=vmem_limit,
        ),
    )(x2, w_pad, b_pad)

    return out[:n, :k]


# ---------------- pure-JAX reference (mirrors the PyTorch code) ---------------
def reference_forward(video_feat, fc_weight, fc_bias):
    pooled = video_feat.astype(jnp.float32).mean(axis=(2, 3))   # (N, C)
    # dropout output is discarded by the original forward (identity at eval),
    # so the reference is just the linear layer on the pooled features.
    return pooled @ fc_weight.T + fc_bias                       # (N, K)


if __name__ == "__main__":
    key = jax.random.PRNGKey(0)
    k1, k2, k3 = jax.random.split(key, 3)

    # B=2 segments x 8 frames = 16 samples; C = 64 (img) + 32 (pose) = 96; 7x7 spatial.
    N, C, H, W = 16, 96, 7, 7
    CLASS_NUM = 60

    video_feat = jax.random.normal(k1, (N, C, H, W), jnp.float32)
    fc_weight = 0.05 * jax.random.normal(k2, (CLASS_NUM, C), jnp.float32)  # torch Linear (out, in)
    fc_bias = 0.05 * jax.random.normal(k3, (CLASS_NUM,), jnp.float32)

    fwd = jax.jit(classifier_forward)        # jit hoists/fuses the weight prep
    logits = jax.block_until_ready(fwd(video_feat, fc_weight, fc_bias))

    ref = reference_forward(video_feat, fc_weight, fc_bias)
    assert logits.shape == (N, CLASS_NUM), logits.shape
    max_err = float(jnp.max(jnp.abs(logits - ref)))
    assert jnp.allclose(logits, ref, atol=1e-3, rtol=1e-3), max_err
    print("KERNEL_OK")
</pallas_src>

<mosaic_0001>
module attributes {stable_mosaic.version = 11 : i64} {
  func.func @classifier_kernel(%arg0: i32, %arg1: memref<16x4704xf32, #tpu.memory_space<vmem>>, %arg2: memref<4704x128xf32, #tpu.memory_space<vmem>>, %arg3: memref<1x128xf32, #tpu.memory_space<vmem>>, %arg4: memref<16x128xf32, #tpu.memory_space<vmem>>) attributes {dimension_semantics = [#tpu.dimension_semantics<parallel>], iteration_bounds = array<i64: 1>, scalar_prefetch = 0 : i64, scratch_operands = 0 : i64, tpu.core_type = #tpu.core_type<tc>, window_params = [{transform_indices = @transform_0, window_bounds = array<i64: 16, 4704>}, {pipeline_mode = #tpu.pipeline_mode<synchronous>, transform_indices = @transform_1, window_bounds = array<i64: 4704, 128>}, {pipeline_mode = #tpu.pipeline_mode<synchronous>, transform_indices = @transform_2, window_bounds = array<i64: 1, 128>}, {transform_indices = @transform_3, window_bounds = array<i64: 16, 128>}]} {
    %c0 = arith.constant 0 : index
    %c0_0 = arith.constant 0 : index
    %0 = vector.load %arg1[%c0, %c0_0] : memref<16x4704xf32, #tpu.memory_space<vmem>>, vector<16x4704xf32>
    %c0_1 = arith.constant 0 : index
    %c0_2 = arith.constant 0 : index
    %1 = vector.load %arg2[%c0_1, %c0_2] : memref<4704x128xf32, #tpu.memory_space<vmem>>, vector<4704x128xf32>
    %cst = arith.constant dense<0.000000e+00> : vector<16x128xf32>
    %2 = tpu.matmul %0, %1, %cst {dimension_numbers = #tpu.dot_dimension_numbers<[1], [0], [0], [1], [0, 0, 1, 1], [], []>} : vector<16x4704xf32>, vector<4704x128xf32>, vector<16x128xf32> -> vector<16x128xf32>
    %c0_3 = arith.constant 0 : index
    %c0_4 = arith.constant 0 : index
    %3 = vector.load %arg3[%c0_3, %c0_4] : memref<1x128xf32, #tpu.memory_space<vmem>>, vector<1x128xf32>
    %4 = vector.broadcast %3 : vector<1x128xf32> to vector<16x128xf32>
    %5 = arith.addf %2, %4 : vector<16x128xf32>
    %c0_5 = arith.constant 0 : index
    %c0_6 = arith.constant 0 : index
    %6 = vector.load %arg4[%c0_5, %c0_6] : memref<16x128xf32, #tpu.memory_space<vmem>>, vector<16x128xf32>
    tpu.vector_store %arg4[%c0_5, %c0_6], %5 {strides = array<i32>} : memref<16x128xf32, #tpu.memory_space<vmem>>, vector<16x128xf32>,
    return
  }
  func.func @transform_0(%arg0: i32) -> (i32, i32) {
    %c0_i32 = arith.constant 0 : i32
    %c0_i32_0 = arith.constant 0 : i32
    return %arg0, %c0_i32 : i32, i32
  }
  func.func @transform_1(%arg0: i32) -> (i32, i32) {
    %c0_i32 = arith.constant 0 : i32
    %c0_i32_0 = arith.constant 0 : i32
    %c0_i32_1 = arith.constant 0 : i32
    return %c0_i32, %c0_i32_0 : i32, i32
  }
  func.func @transform_2(%arg0: i32) -> (i32, i32) {
    %c0_i32 = arith.constant 0 : i32
    %c0_i32_0 = arith.constant 0 : i32
    %c0_i32_1 = arith.constant 0 : i32
    return %c0_i32, %c0_i32_0 : i32, i32
  }
  func.func @transform_3(%arg0: i32) -> (i32, i32) {
    %c0_i32 = arith.constant 0 : i32
    %c0_i32_0 = arith.constant 0 : i32
    return %arg0, %c0_i32 : i32, i32
  }
}

</mosaic_0001>

<bundles_post_ra>
// kernel: classifier_forward.1
= control target key start
LH: loop header
LB: loop body
LE: loop exit
PB: predicated region body
PF: predicated region fallthrough
CT: control target
= control target key end

     0   :  { %s3631_s0 = inlined_call_operand.vmem [shape: f32[16,4704], index: 0, kind: input, shape index: {}]   ;;  %s3632_s1 = inlined_call_operand.vmem [shape: f32[4704,128], index: 1, kind: input, shape index: {}]   ;;  %s3633_s2 = inlined_call_operand.vmem [shape: f32[1,128], index: 2, kind: input, shape index: {}]   ;;  %s3634_s3 = inlined_call_operand.hbm [shape: f32[16,128], index: 3, kind: output, shape index: {}]  }
   0x1   :  { %v104_v0 = vld [vmem:[%s3632_s1 + $0x78] sm:$0xff]  ;;  %v103_v3 = vld [vmem:[%s3632_s1 + $0x70] sm:$0xff]  ;;  %v102_v7 = vld [vmem:[%s3632_s1 + $0x68] sm:$0xff] }
   0x2   :  { %v120_v1 = vld [vmem:[%s3632_s1 + $0xf8] sm:$0xff]  ;;  %688 = vmatpush.msra.mxu0 %v104_v0  ;;  %v119_v4 = vld [vmem:[%s3632_s1 + $0xf0] sm:$0xff]  ;;  %v118_v8 = vld [vmem:[%s3632_s1 + $0xe8] sm:$0xff] }
   0x3   :  { %v136_v2 = vld [vmem:[%s3632_s1 + $0x178] sm:$0xff]  ;;  %711 = vmatpush.msra.mxu1 %v120_v1  ;;  %v135_v5 = vld [vmem:[%s3632_s1 + $0x170] sm:$0xff]  ;;  %v134_v9 = vld [vmem:[%s3632_s1 + $0x168] sm:$0xff] }
   0x4   :  { %734 = vmatpush.msra.mxu2 %v136_v2  ;;  %v152_v6 = vld [vmem:[%s3632_s1 + $0x1f8] sm:$0xff]  ;;  %689 = vmatpush.msra.mxu0 %v103_v3  ;;  %v151_v10 = vld [vmem:[%s3632_s1 + $0x1f0] sm:$0xff]  ;;  %v101_v11 = vld [vmem:[%s3632_s1 + $0x60] sm:$0xff] }
   0x5   :  { %712 = vmatpush.msra.mxu1 %v119_v4  ;;  %757 = vmatpush.msra.mxu3 %v152_v6  ;;  %v117_v12 = vld [vmem:[%s3632_s1 + $0xe0] sm:$0xff]  ;;  %v150_v14 = vld [vmem:[%s3632_s1 + $0x1e8] sm:$0xff]  ;;  %v100_v15 = vld [vmem:[%s3632_s1 + $0x58] sm:$0xff] }
   0x6   :  { %735 = vmatpush.msra.mxu2 %v135_v5  ;;  %690 = vmatpush.msra.mxu0 %v102_v7  ;;  %v133_v13 = vld [vmem:[%s3632_s1 + $0x160] sm:$0xff]  ;;  %v116_v16 = vld [vmem:[%s3632_s1 + $0xd8] sm:$0xff]  ;;  %v99_v19 = vld [vmem:[%s3632_s1 + $0x50] sm:$0xff] }
   0x7   :  { %713 = vmatpush.msra.mxu1 %v118_v8  ;;  %758 = vmatpush.msra.mxu3 %v151_v10  ;;  %v132_v17 = vld [vmem:[%s3632_s1 + $0x158] sm:$0xff]  ;;  %v149_v18 = vld [vmem:[%s3632_s1 + $0x1e0] sm:$0xff]  ;;  %v115_v20 = vld [vmem:[%s3632_s1 + $0xd0] sm:$0xff] }
   0x8   :  { %736 = vmatpush.msra.mxu2 %v134_v9  ;;  %691 = vmatpush.msra.mxu0 %v101_v11  ;;  %v131_v21 = vld [vmem:[%s3632_s1 + $0x150] sm:$0xff]  ;;  %v148_v22 = vld [vmem:[%s3632_s1 + $0x1d8] sm:$0xff]  ;;  %v98_v23 = vld [vmem:[%s3632_s1 + $0x48] sm:$0xff] }
   0x9   :  { %714 = vmatpush.msra.mxu1 %v117_v12  ;;  %759 = vmatpush.msra.mxu3 %v150_v14  ;;  %v114_v24 = vld [vmem:[%s3632_s1 + $0xc8] sm:$0xff]  ;;  %v147_v26 = vld [vmem:[%s3632_s1 + $0x1d0] sm:$0xff]  ;;  %v97_v27 = vld [vmem:[%s3632_s1 + $0x40] sm:$0xff] }
   0xa   :  { %737 = vmatpush.msra.mxu2 %v133_v13  ;;  %692 = vmatpush.msra.mxu0 %v100_v15  ;;  %v130_v25 = vld [vmem:[%s3632_s1 + $0x148] sm:$0xff]  ;;  %v113_v28 = vld [vmem:[%s3632_s1 + $0xc0] sm:$0xff]  ;;  %v96_v31 = vld [vmem:[%s3632_s1 + $0x38] sm:$0xff] }
   0xb   :  { %715 = vmatpush.msra.mxu1 %v116_v16  ;;  %760 = vmatpush.msra.mxu3 %v149_v18  ;;  %v129_v29 = vld [vmem:[%s3632_s1 + $0x140] sm:$0xff]  ;;  %v146_v30 = vld [vmem:[%s3632_s1 + $0x1c8] sm:$0xff]  ;;  %v112_v32 = vld [vmem:[%s3632_s1 + $0xb8] sm:$0xff] }
   0xc   :  { %738 = vmatpush.msra.mxu2 %v132_v17  ;;  %693 = vmatpush.msra.mxu0 %v99_v19  ;;  %v128_v33 = vld [vmem:[%s3632_s1 + $0x138] sm:$0xff]  ;;  %v145_v34 = vld [vmem:[%s3632_s1 + $0x1c0] sm:$0xff]  ;;  %v95_v35 = vld [vmem:[%s3632_s1 + $0x30] sm:$0xff] }
   0xd   :  { %716 = vmatpush.msra.mxu1 %v115_v20  ;;  %761 = vmatpush.msra.mxu3 %v148_v22  ;;  %v111_v36 = vld [vmem:[%s3632_s1 + $0xb0] sm:$0xff]  ;;  %v144_v38 = vld [vmem:[%s3632_s1 + $0x1b8] sm:$0xff]  ;;  %v94_v39 = vld [vmem:[%s3632_s1 + $0x28] sm:$0xff] }
   0xe   :  { %739 = vmatpush.msra.mxu2 %v131_v21  ;;  %694 = vmatpush.msra.mxu0 %v98_v23  ;;  %v127_v37 = vld [vmem:[%s3632_s1 + $0x130] sm:$0xff]  ;;  %v110_v40 = vld [vmem:[%s3632_s1 + $0xa8] sm:$0xff]  ;;  %v93_v43 = vld [vmem:[%s3632_s1 + $0x20] sm:$0xff] }
   0xf   :  { %717 = vmatpush.msra.mxu1 %v114_v24  ;;  %762 = vmatpush.msra.mxu3 %v147_v26  ;;  %v126_v41 = vld [vmem:[%s3632_s1 + $0x128] sm:$0xff]  ;;  %v143_v42 = vld [vmem:[%s3632_s1 + $0x1b0] sm:$0xff]  ;;  %v109_v44 = vld [vmem:[%s3632_s1 + $0xa0] sm:$0xff] }
  0x10   :  { %740 = vmatpush.msra.mxu2 %v130_v25  ;;  %695 = vmatpush.msra.mxu0 %v97_v27  ;;  %v125_v45 = vld [vmem:[%s3632_s1 + $0x120] sm:$0xff]  ;;  %v142_v46 = vld [vmem:[%s3632_s1 + $0x1a8] sm:$0xff]  ;;  %v92_v47 = vld [vmem:[%s3632_s1 + $0x18] sm:$0xff] }
  0x11   :  { %718 = vmatpush.msra.mxu1 %v113_v28  ;;  %763 = vmatpush.msra.mxu3 %v146_v30  ;;  %v108_v48 = vld [vmem:[%s3632_s1 + $0x98] sm:$0xff]  ;;  %v141_v50 = vld [vmem:[%s3632_s1 + $0x1a0] sm:$0xff]  ;;  %v91_v51 = vld [vmem:[%s3632_s1 + $0x10] sm:$0xff] }
  0x12   :  { %741 = vmatpush.msra.mxu2 %v129_v29  ;;  %696 = vmatpush.msra.mxu0 %v96_v31  ;;  %v124_v49 = vld [vmem:[%s3632_s1 + $0x118] sm:$0xff]  ;;  %v107_v52 = vld [vmem:[%s3632_s1 + $0x90] sm:$0xff]  ;;  %v90_v55 = vld [vmem:[%s3632_s1 + $0x8] sm:$0xff] }
  0x13   :  { %719 = vmatpush.msra.mxu1 %v112_v32  ;;  %764 = vmatpush.msra.mxu3 %v145_v34  ;;  %v123_v53 = vld [vmem:[%s3632_s1 + $0x110] sm:$0xff]  ;;  %v140_v54 = vld [vmem:[%s3632_s1 + $0x198] sm:$0xff]  ;;  %v106_v56 = vld [vmem:[%s3632_s1 + $0x88] sm:$0xff] }
  0x14   :  { %742 = vmatpush.msra.mxu2 %v128_v33  ;;  %697 = vmatpush.msra.mxu0 %v95_v35  ;;  %v122_v57 = vld [vmem:[%s3632_s1 + $0x108] sm:$0xff]  ;;  %v139_v58 = vld [vmem:[%s3632_s1 + $0x190] sm:$0xff]  ;;  %v89_v59 = vld [vmem:[%s3632_s1] sm:$0xff] }
  0x15   :  { %720 = vmatpush.msra.mxu1 %v111_v36  ;;  %765 = vmatpush.msra.mxu3 %v144_v38  ;;  %v105_v60 = vld [vmem:[%s3632_s1 + $0x80] sm:$0xff]  ;;  %v138_v62 = vld [vmem:[%s3632_s1 + $0x188] sm:$0xff]  ;;  %v168_v63 = vld [vmem:[%s3632_s1 + $0x278] sm:$0xff] }
  0x16   :  { %743 = vmatpush.msra.mxu2 %v127_v37  ;;  %698 = vmatpush.msra.mxu0 %v94_v39  ;;  %v121_v61 = vld [vmem:[%s3632_s1 + $0x100] sm:$0xff]  ;;  %v184_v0 = vld [vmem:[%s3632_s1 + $0x2f8] sm:$0xff]  ;;  %v167_v3 = vld [vmem:[%s3632_s1 + $0x270] sm:$0xff] }
  0x17   :  { %721 = vmatpush.msra.mxu1 %v110_v40  ;;  %766 = vmatpush.msra.mxu3 %v143_v42  ;;  %v200_v1 = vld [vmem:[%s3632_s1 + $0x378] sm:$0xff]  ;;  %v137_v2 = vld [vmem:[%s3632_s1 + $0x180] sm:$0xff]  ;;  %v183_v4 = vld [vmem:[%s3632_s1 + $0x2f0] sm:$0xff] }
  0x18   :  { %744 = vmatpush.msra.mxu2 %v126_v41  ;;  %699 = vmatpush.msra.mxu0 %v93_v43  ;;  %v199_v5 = vld [vmem:[%s3632_s1 + $0x370] sm:$0xff]  ;;  %v216_v6 = vld [vmem:[%s3632_s1 + $0x3f8] sm:$0xff]  ;;  %v166_v7 = vld [vmem:[%s3632_s1 + $0x268] sm:$0xff] }
  0x19   :  { %722 = vmatpush.msra.mxu1 %v109_v44  ;;  %767 = vmatpush.msra.mxu3 %v142_v46  ;;  %v182_v8 = vld [vmem:[%s3632_s1 + $0x2e8] sm:$0xff]  ;;  %v215_v10 = vld [vmem:[%s3632_s1 + $0x3f0] sm:$0xff]  ;;  %v165_v11 = vld [vmem:[%s3632_s1 + $0x260] sm:$0xff] }
  0x1a   :  { %745 = vmatpush.msra.mxu2 %v125_v45  ;;  %700 = vmatpush.msra.mxu0 %v92_v47  ;;  %v198_v9 = vld [vmem:[%s3632_s1 + $0x368] sm:$0xff]  ;;  %v181_v12 = vld [vmem:[%s3632_s1 + $0x2e0] sm:$0xff]  ;;  %v164_v15 = vld [vmem:[%s3632_s1 + $0x258] sm:$0xff] }
  0x1b   :  { %723 = vmatpush.msra.mxu1 %v108_v48  ;;  %768 = vmatpush.msra.mxu3 %v141_v50  ;;  %v197_v13 = vld [vmem:[%s3632_s1 + $0x360] sm:$0xff]  ;;  %v214_v14 = vld [vmem:[%s3632_s1 + $0x3e8] sm:$0xff]  ;;  %v180_v16 = vld [vmem:[%s3632_s1 + $0x2d8] sm:$0xff] }
  0x1c   :  { %746 = vmatpush.msra.mxu2 %v124_v49  ;;  %701 = vmatpush.msra.mxu0 %v91_v51  ;;  %v196_v17 = vld [vmem:[%s3632_s1 + $0x358] sm:$0xff]  ;;  %v213_v18 = vld [vmem:[%s3632_s1 + $0x3e0] sm:$0xff]  ;;  %v163_v19 = vld [vmem:[%s3632_s1 + $0x250] sm:$0xff] }
  0x1d   :  { %724 = vmatpush.msra.mxu1 %v107_v52  ;;  %769 = vmatpush.msra.mxu3 %v140_v54  ;;  %v179_v20 = vld [vmem:[%s3632_s1 + $0x2d0] sm:$0xff]  ;;  %v212_v22 = vld [vmem:[%s3632_s1 + $0x3d8] sm:$0xff]  ;;  %v162_v23 = vld [vmem:[%s3632_s1 + $0x248] sm:$0xff] }
  0x1e   :  { %747 = vmatpush.msra.mxu2 %v123_v53  ;;  %702 = vmatpush.msra.mxu0 %v90_v55  ;;  %v195_v21 = vld [vmem:[%s3632_s1 + $0x350] sm:$0xff]  ;;  %v178_v24 = vld [vmem:[%s3632_s1 + $0x2c8] sm:$0xff]  ;;  %v161_v27 = vld [vmem:[%s3632_s1 + $0x240] sm:$0xff] }
  0x1f   :  { %725 = vmatpush.msra.mxu1 %v106_v56  ;;  %770 = vmatpush.msra.mxu3 %v139_v58  ;;  %v194_v25 = vld [vmem:[%s3632_s1 + $0x348] sm:$0xff]  ;;  %v211_v26 = vld [vmem:[%s3632_s1 + $0x3d0] sm:$0xff]  ;;  %v177_v28 = vld [vmem:[%s3632_s1 + $0x2c0] sm:$0xff] }
  0x20   :  { %748 = vmatpush.msra.mxu2 %v122_v57  ;;  %703 = vmatpush.msra.mxu0 %v89_v59  ;;  %v193_v29 = vld [vmem:[%s3632_s1 + $0x340] sm:$0xff]  ;;  %v210_v30 = vld [vmem:[%s3632_s1 + $0x3c8] sm:$0xff]  ;;  %v160_v31 = vld [vmem:[%s3632_s1 + $0x238] sm:$0xff] }
  0x21   :  { %726 = vmatpush.msra.mxu1 %v105_v60  ;;  %771 = vmatpush.msra.mxu3 %v138_v62  ;;  %v176_v32 = vld [vmem:[%s3632_s1 + $0x2b8] sm:$0xff]  ;;  %v209_v34 = vld [vmem:[%s3632_s1 + $0x3c0] sm:$0xff]  ;;  %v159_v35 = vld [vmem:[%s3632_s1 + $0x230] sm:$0xff] }
  0x22   :  { %749 = vmatpush.msra.mxu2 %v121_v61  ;;  %780 = vmatpush.msrb.mxu0 %v168_v63  ;;  %v192_v33 = vld [vmem:[%s3632_s1 + $0x338] sm:$0xff]  ;;  %v175_v36 = vld [vmem:[%s3632_s1 + $0x2b0] sm:$0xff]  ;;  %v158_v40 = vld [vmem:[%s3632_s1 + $0x228] sm:$0xff] }
  0x23   :  { %803 = vmatpush.msrb.mxu1 %v184_v0  ;;  %772 = vmatpush.msra.mxu3 %v137_v2  ;;  %v191_v37 = vld [vmem:[%s3632_s1 + $0x330] sm:$0xff]  ;;  %v208_v38 = vld [vmem:[%s3632_s1 + $0x3b8] sm:$0xff]  ;;  %v174_v41 = vld [vmem:[%s3632_s1 + $0x2a8] sm:$0xff] }
  0x24   :  { %826 = vmatpush.msrb.mxu2 %v200_v1  ;;  %781 = vmatpush.msrb.mxu0 %v167_v3  ;;  %v17_v39 = vld [vmem:[%s3631_s0 + $0x10] sm:$0xff]  ;;  %v190_v42 = vld [vmem:[%s3632_s1 + $0x328] sm:$0xff]  ;;  %v15_v44 = vld [vmem:[%s3631_s0] sm:$0xff] }
  0x25   :  { %804 = vmatpush.msrb.mxu1 %v183_v4  ;;  %849 = vmatpush.msrb.mxu3 %v216_v6  ;;  %v207_v43 = vld [vmem:[%s3632_s1 + $0x3b0] sm:$0xff]  ;;  %v18_v45 = vld [vmem:[%s3631_s0 + $0x18] sm:$0xff]  ;;  %v157_v46 = vld [vmem:[%s3632_s1 + $0x220] sm:$0xff] }
  0x26   :  { %827 = vmatpush.msrb.mxu2 %v199_v5  ;;  %782 = vmatpush.msrb.mxu0 %v166_v7  ;;  %v173_v47 = vld [vmem:[%s3632_s1 + $0x2a0] sm:$0xff]  ;;  %v206_v49 = vld [vmem:[%s3632_s1 + $0x3a8] sm:$0xff]  ;;  %v156_v51 = vld [vmem:[%s3632_s1 + $0x218] sm:$0xff] }
  0x27   :  { %805 = vmatpush.msrb.mxu1 %v182_v8  ;;  %850 = vmatpush.msrb.mxu3 %v215_v10  ;;  %v189_v48 = vld [vmem:[%s3632_s1 + $0x320] sm:$0xff]  ;;  %v16_v50 = vld [vmem:[%s3631_s0 + $0x8] sm:$0xff]  ;;  %v172_v52 = vld [vmem:[%s3632_s1 + $0x298] sm:$0xff] }
  0x28   :  { %828 = vmatpush.msrb.mxu2 %v198_v9  ;;  %783 = vmatpush.msrb.mxu0 %v165_v11  ;;  %v188_v53 = vld [vmem:[%s3632_s1 + $0x318] sm:$0xff]  ;;  %v205_v54 = vld [vmem:[%s3632_s1 + $0x3a0] sm:$0xff]  ;;  %v155_v55 = vld [vmem:[%s3632_s1 + $0x210] sm:$0xff] }
  0x29   :  { %806 = vmatpush.msrb.mxu1 %v181_v12  ;;  %851 = vmatpush.msrb.mxu3 %v214_v14  ;;  %v171_v56 = vld [vmem:[%s3632_s1 + $0x290] sm:$0xff]  ;;  %v204_v58 = vld [vmem:[%s3632_s1 + $0x398] sm:$0xff]  ;;  %v154_v60 = vld [vmem:[%s3632_s1 + $0x208] sm:$0xff] }
  0x2a   :  { %829 = vmatpush.msrb.mxu2 %v197_v13  ;;  %784 = vmatpush.msrb.mxu0 %v164_v15  ;;  %v187_v57 = vld [vmem:[%s3632_s1 + $0x310] sm:$0xff]  ;;  %v54_v59 = vld [vmem:[%s3631_s0 + $0x138] sm:$0xff]  ;;  %v170_v61 = vld [vmem:[%s3632_s1 + $0x288] sm:$0xff] }
  0x2b   :  { %807 = vmatpush.msrb.mxu1 %v180_v16  ;;  %852 = vmatpush.msrb.mxu3 %v213_v18  ;;  %v186_v62 = vld [vmem:[%s3632_s1 + $0x308] sm:$0xff]  ;;  %v203_v63 = vld [vmem:[%s3632_s1 + $0x390] sm:$0xff]  ;;  %v55_v1 = vld [vmem:[%s3631_s0 + $0x140] sm:$0xff] }
  0x2c   :  { %830 = vmatpush.msrb.mxu2 %v196_v17  ;;  %785 = vmatpush.msrb.mxu0 %v163_v19  ;;  %v52_v0 = vld [vmem:[%s3631_s0 + $0x128] sm:$0xff]  ;;  %v153_v2 = vld [vmem:[%s3632_s1 + $0x200] sm:$0xff] }
  0x2d   :  { %808 = vmatpush.msrb.mxu1 %v179_v20  ;;  %853 = vmatpush.msrb.mxu3 %v212_v22  ;;  %v169_v3 = vld [vmem:[%s3632_s1 + $0x280] sm:$0xff] }
  0x2e   :  { %831 = vmatpush.msrb.mxu2 %v195_v21  ;;  %786 = vmatpush.msrb.mxu0 %v162_v23  ;;  %v185_v4 = vld [vmem:[%s3632_s1 + $0x300] sm:$0xff] }
  0x2f   :  { %809 = vmatpush.msrb.mxu1 %v178_v24  ;;  %854 = vmatpush.msrb.mxu3 %v211_v26 }
  0x30   :  { %832 = vmatpush.msrb.mxu2 %v194_v25  ;;  %787 = vmatpush.msrb.mxu0 %v161_v27 }
  0x31   :  { %810 = vmatpush.msrb.mxu1 %v177_v28  ;;  %855 = vmatpush.msrb.mxu3 %v210_v30 }
  0x32   :  { %833 = vmatpush.msrb.mxu2 %v193_v29  ;;  %788 = vmatpush.msrb.mxu0 %v160_v31 }
  0x33   :  { %811 = vmatpush.msrb.mxu1 %v176_v32  ;;  %856 = vmatpush.msrb.mxu3 %v209_v34 }
  0x34   :  { %834 = vmatpush.msrb.mxu2 %v192_v33  ;;  %789 = vmatpush.msrb.mxu0 %v159_v35 }
  0x35   :  { %812 = vmatpush.msrb.mxu1 %v175_v36  ;;  %857 = vmatpush.msrb.mxu3 %v208_v38 }
  0x36   :  { %835 = vmatpush.msrb.mxu2 %v191_v37  ;;  %790 = vmatpush.msrb.mxu0 %v158_v40 }
  0x37   :  { %750 = vmatmul.f32.vlgmr.msra.gmra.mxu2 %v17_v39  ;;  %813 = vmatpush.msrb.mxu1 %v174_v41 }
  0x38   :  { %836 = vmatpush.msrb.mxu2 %v190_v42  ;;  %858 = vmatpush.msrb.mxu3 %v207_v43 }
  0x39   :  { %704 = vmatmul.f32.vlgmr.msra.gmra.mxu0 %v15_v44  ;;  %773 = vmatmul.f32.vlgmr.msra.gmra.mxu3 %v18_v45 }
  0x3a   :  { %791 = vmatpush.msrb.mxu0 %v157_v46  ;;  %814 = vmatpush.msrb.mxu1 %v173_v47 }
  0x3b   :  { %837 = vmatpush.msrb.mxu2 %v189_v48  ;;  %859 = vmatpush.msrb.mxu3 %v206_v49 }
  0x3c   :  { %727 = vmatmul.f32.vlgmr.msra.gmra.mxu1 %v16_v50  ;;  %792 = vmatpush.msrb.mxu0 %v156_v51 }
  0x3d   :  { %815 = vmatpush.msrb.mxu1 %v172_v52  ;;  %838 = vmatpush.msrb.mxu2 %v188_v53 }
  0x3e   :  { %860 = vmatpush.msrb.mxu3 %v205_v54  ;;  %793 = vmatpush.msrb.mxu0 %v155_v55 }
  0x3f   :  { %816 = vmatpush.msrb.mxu1 %v171_v56  ;;  %839 = vmatpush.msrb.mxu2 %v187_v57 }
  0x40   :  { %861 = vmatpush.msrb.mxu3 %v204_v58  ;;  %753 = vmatmul.f32.gmra.mxu2 %v54_v59 }
  0x41   :  { %794 = vmatpush.msrb.mxu0 %v154_v60  ;;  %817 = vmatpush.msrb.mxu1 %v170_v61 }
  0x42   :  { %840 = vmatpush.msrb.mxu2 %v186_v62 }
  0x43   :  { %8 = vsyncpa [#allocation3], 0  ;;  %862 = vmatpush.msrb.mxu3 %v203_v63  ;;  %707 = vmatmul.f32.gmra.mxu0 %v52_v0  ;;  %v202_v5 = vld [vmem:[%s3632_s1 + $0x388] sm:$0xff]  ;;  %v53_v6 = vld [vmem:[%s3631_s0 + $0x130] sm:$0xff]  ;;  %vm681_vm0 = vcmask 785408   ;;  %s1547_s22 = sshll.u32 %s3634_s3, 4  ;;  %s1548_s22 = int_to_ptr.hbm [resolvable:$true] %s1547_s22 }
  0x44   :  { %776 = vmatmul.f32.gmra.mxu3 %v55_v1  ;;  %795 = vmatpush.msrb.mxu0 %v153_v2  ;;  %v232_v7 = vld [vmem:[%s3632_s1 + $0x478] sm:$0xff]  ;;  %v201_v10 = vld [vmem:[%s3632_s1 + $0x380] sm:$0xff]  ;;  %v231_v11 = vld [vmem:[%s3632_s1 + $0x470] sm:$0xff]  ;;  %s1604_s23 = smov 128   ;;  %s1605_s24 = smov 8  }
  0x45   :  { %v248_v8 = vld [vmem:[%s3632_s1 + $0x4f8] sm:$0xff]  ;;  %818 = vmatpush.msrb.mxu1 %v169_v3  ;;  %841 = vmatpush.msrb.mxu2 %v185_v4  ;;  %v247_v12 = vld [vmem:[%s3632_s1 + $0x4f0] sm:$0xff]  ;;  %v230_v16 = vld [vmem:[%s3632_s1 + $0x468] sm:$0xff] }
  0x46   :  { %v264_v9 = vld [vmem:[%s3632_s1 + $0x578] sm:$0xff]  ;;  %863 = vmatpush.msrb.mxu3 %v202_v5  ;;  %730 = vmatmul.f32.gmra.mxu1 %v53_v6  ;;  %v263_v13 = vld [vmem:[%s3632_s1 + $0x570] sm:$0xff]  ;;  %v246_v17 = vld [vmem:[%s3632_s1 + $0x4e8] sm:$0xff] }
  0x47   :  { %872 = vmatpush.msra.mxu0 %v232_v7  ;;  %895 = vmatpush.msra.mxu1 %v248_v8  ;;  %v280_v14 = vld [vmem:[%s3632_s1 + $0x5f8] sm:$0xff]  ;;  %v21_v15 = vld [vmem:[%s3631_s0 + $0x30] sm:$0xff]  ;;  %v262_v18 = vld [vmem:[%s3632_s1 + $0x568] sm:$0xff] }
  0x48   :  { %918 = vmatpush.msra.mxu2 %v264_v9  ;;  %864 = vmatpush.msrb.mxu3 %v201_v10  ;;  %v279_v19 = vld [vmem:[%s3632_s1 + $0x5f0] sm:$0xff]  ;;  %v19_v20 = vld [vmem:[%s3631_s0 + $0x20] sm:$0xff]  ;;  %v22_v21 = vld [vmem:[%s3631_s0 + $0x38] sm:$0xff] }
  0x49   :  { %873 = vmatpush.msra.mxu0 %v231_v11  ;;  %896 = vmatpush.msra.mxu1 %v247_v12  ;;  %v229_v22 = vld [vmem:[%s3632_s1 + $0x460] sm:$0xff]  ;;  %v278_v25 = vld [vmem:[%s3632_s1 + $0x5e8] sm:$0xff]  ;;  %v228_v27 = vld [vmem:[%s3632_s1 + $0x458] sm:$0xff] }
  0x4a   :  { %919 = vmatpush.msra.mxu2 %v263_v13  ;;  %941 = vmatpush.msra.mxu3 %v280_v14  ;;  %v245_v23 = vld [vmem:[%s3632_s1 + $0x4e0] sm:$0xff]  ;;  %v20_v26 = vld [vmem:[%s3631_s0 + $0x28] sm:$0xff]  ;;  %v244_v28 = vld [vmem:[%s3632_s1 + $0x4d8] sm:$0xff] }
  0x4b   :  { %842 = vmatmul.f32.vlgmr.msrb.gmra.mxu2 %v21_v15  ;;  %874 = vmatpush.msra.mxu0 %v230_v16  ;;  %v261_v24 = vld [vmem:[%s3632_s1 + $0x560] sm:$0xff]  ;;  %v260_v29 = vld [vmem:[%s3632_s1 + $0x558] sm:$0xff]  ;;  %v227_v31 = vld [vmem:[%s3632_s1 + $0x450] sm:$0xff] }
  0x4c   :  { %897 = vmatpush.msra.mxu1 %v246_v17  ;;  %920 = vmatpush.msra.mxu2 %v262_v18  ;;  %v277_v30 = vld [vmem:[%s3632_s1 + $0x5e0] sm:$0xff]  ;;  %v243_v32 = vld [vmem:[%s3632_s1 + $0x4d0] sm:$0xff]  ;;  %v276_v34 = vld [vmem:[%s3632_s1 + $0x5d8] sm:$0xff] }
  0x4d   :  { %942 = vmatpush.msra.mxu3 %v279_v19  ;;  %796 = vmatmul.f32.vlgmr.msrb.gmra.mxu0 %v19_v20  ;;  %v259_v33 = vld [vmem:[%s3632_s1 + $0x550] sm:$0xff]  ;;  %v226_v35 = vld [vmem:[%s3632_s1 + $0x448] sm:$0xff]  ;;  %v225_v39 = vld [vmem:[%s3632_s1 + $0x440] sm:$0xff] }
  0x4e   :  { %865 = vmatmul.f32.vlgmr.msrb.gmra.mxu3 %v22_v21  ;;  %875 = vmatpush.msra.mxu0 %v229_v22  ;;  %v242_v36 = vld [vmem:[%s3632_s1 + $0x4c8] sm:$0xff]  ;;  %v275_v38 = vld [vmem:[%s3632_s1 + $0x5d0] sm:$0xff]  ;;  %v241_v40 = vld [vmem:[%s3632_s1 + $0x4c0] sm:$0xff] }
  0x4f   :  { %898 = vmatpush.msra.mxu1 %v245_v23  ;;  %921 = vmatpush.msra.mxu2 %v261_v24  ;;  %v258_v37 = vld [vmem:[%s3632_s1 + $0x548] sm:$0xff]  ;;  %v257_v41 = vld [vmem:[%s3632_s1 + $0x540] sm:$0xff]  ;;  %v224_v43 = vld [vmem:[%s3632_s1 + $0x438] sm:$0xff] }
  0x50   :  { %943 = vmatpush.msra.mxu3 %v278_v25  ;;  %819 = vmatmul.f32.vlgmr.msrb.gmra.mxu1 %v20_v26  ;;  %v274_v42 = vld [vmem:[%s3632_s1 + $0x5c8] sm:$0xff]  ;;  %v240_v44 = vld [vmem:[%s3632_s1 + $0x4b8] sm:$0xff]  ;;  %v273_v46 = vld [vmem:[%s3632_s1 + $0x5c0] sm:$0xff] }
  0x51   :  { %876 = vmatpush.msra.mxu0 %v228_v27  ;;  %899 = vmatpush.msra.mxu1 %v244_v28  ;;  %v256_v45 = vld [vmem:[%s3632_s1 + $0x538] sm:$0xff]  ;;  %v223_v47 = vld [vmem:[%s3632_s1 + $0x430] sm:$0xff]  ;;  %v222_v51 = vld [vmem:[%s3632_s1 + $0x428] sm:$0xff] }
  0x52   :  { %922 = vmatpush.msra.mxu2 %v260_v29  ;;  %944 = vmatpush.msra.mxu3 %v277_v30  ;;  %v239_v48 = vld [vmem:[%s3632_s1 + $0x4b0] sm:$0xff]  ;;  %v272_v50 = vld [vmem:[%s3632_s1 + $0x5b8] sm:$0xff]  ;;  %v238_v52 = vld [vmem:[%s3632_s1 + $0x4a8] sm:$0xff] }
  0x53   :  { %877 = vmatpush.msra.mxu0 %v227_v31  ;;  %900 = vmatpush.msra.mxu1 %v243_v32  ;;  %v255_v49 = vld [vmem:[%s3632_s1 + $0x530] sm:$0xff]  ;;  %v254_v53 = vld [vmem:[%s3632_s1 + $0x528] sm:$0xff]  ;;  %v221_v55 = vld [vmem:[%s3632_s1 + $0x420] sm:$0xff] }
  0x54   :  { %923 = vmatpush.msra.mxu2 %v259_v33  ;;  %945 = vmatpush.msra.mxu3 %v276_v34  ;;  %v271_v54 = vld [vmem:[%s3632_s1 + $0x5b0] sm:$0xff]  ;;  %v237_v56 = vld [vmem:[%s3632_s1 + $0x4a0] sm:$0xff]  ;;  %v270_v58 = vld [vmem:[%s3632_s1 + $0x5a8] sm:$0xff] }
  0x55   :  { %878 = vmatpush.msra.mxu0 %v226_v35  ;;  %901 = vmatpush.msra.mxu1 %v242_v36  ;;  %v253_v57 = vld [vmem:[%s3632_s1 + $0x520] sm:$0xff]  ;;  %v56_v59 = vld [vmem:[%s3631_s0 + $0x148] sm:$0xff]  ;;  %v58_v60 = vld [vmem:[%s3631_s0 + $0x158] sm:$0xff] }
  0x56   :  { %924 = vmatpush.msra.mxu2 %v258_v37  ;;  %946 = vmatpush.msra.mxu3 %v275_v38  ;;  %v220_v61 = vld [vmem:[%s3632_s1 + $0x418] sm:$0xff]  ;;  %v269_v0 = vld [vmem:[%s3632_s1 + $0x5a0] sm:$0xff]  ;;  %v57_v1 = vld [vmem:[%s3631_s0 + $0x150] sm:$0xff] }
  0x57   :  { %879 = vmatpush.msra.mxu0 %v225_v39  ;;  %902 = vmatpush.msra.mxu1 %v241_v40  ;;  %v236_v62 = vld [vmem:[%s3632_s1 + $0x498] sm:$0xff]  ;;  %v59_v2 = vld [vmem:[%s3631_s0 + $0x160] sm:$0xff]  ;;  %v219_v3 = vld [vmem:[%s3632_s1 + $0x410] sm:$0xff] }
  0x58   :  { %925 = vmatpush.msra.mxu2 %v257_v41  ;;  %947 = vmatpush.msra.mxu3 %v274_v42  ;;  %v252_v63 = vld [vmem:[%s3632_s1 + $0x518] sm:$0xff]  ;;  %v235_v4 = vld [vmem:[%s3632_s1 + $0x490] sm:$0xff]  ;;  %v218_v7 = vld [vmem:[%s3632_s1 + $0x408] sm:$0xff] }
  0x59   :  { %880 = vmatpush.msra.mxu0 %v224_v43  ;;  %903 = vmatpush.msra.mxu1 %v240_v44  ;;  %v251_v5 = vld [vmem:[%s3632_s1 + $0x510] sm:$0xff]  ;;  %v268_v6 = vld [vmem:[%s3632_s1 + $0x598] sm:$0xff]  ;;  %v234_v8 = vld [vmem:[%s3632_s1 + $0x488] sm:$0xff] }
  0x5a   :  { %926 = vmatpush.msra.mxu2 %v256_v45  ;;  %948 = vmatpush.msra.mxu3 %v273_v46  ;;  %v250_v9 = vld [vmem:[%s3632_s1 + $0x508] sm:$0xff]  ;;  %v267_v10 = vld [vmem:[%s3632_s1 + $0x590] sm:$0xff]  ;;  %v217_v11 = vld [vmem:[%s3632_s1 + $0x400] sm:$0xff] }
  0x5b   :  { %881 = vmatpush.msra.mxu0 %v223_v47  ;;  %904 = vmatpush.msra.mxu1 %v239_v48  ;;  %v233_v12 = vld [vmem:[%s3632_s1 + $0x480] sm:$0xff]  ;;  %v266_v14 = vld [vmem:[%s3632_s1 + $0x588] sm:$0xff]  ;;  %v25_v16 = vld [vmem:[%s3631_s0 + $0x50] sm:$0xff] }
  0x5c   :  { %927 = vmatpush.msra.mxu2 %v255_v49  ;;  %949 = vmatpush.msra.mxu3 %v272_v50  ;;  %v249_v13 = vld [vmem:[%s3632_s1 + $0x500] sm:$0xff]  ;;  %v296_v17 = vld [vmem:[%s3632_s1 + $0x678] sm:$0xff]  ;;  %v24_v21 = vld [vmem:[%s3631_s0 + $0x48] sm:$0xff] }
  0x5d   :  { %882 = vmatpush.msra.mxu0 %v222_v51  ;;  %905 = vmatpush.msra.mxu1 %v238_v52  ;;  %v23_v15 = vld [vmem:[%s3631_s0 + $0x40] sm:$0xff]  ;;  %v312_v18 = vld [vmem:[%s3632_s1 + $0x6f8] sm:$0xff]  ;;  %v295_v23 = vld [vmem:[%s3632_s1 + $0x670] sm:$0xff] }
  0x5e   :  { %928 = vmatpush.msra.mxu2 %v254_v53  ;;  %950 = vmatpush.msra.mxu3 %v271_v54  ;;  %v328_v19 = vld [vmem:[%s3632_s1 + $0x778] sm:$0xff]  ;;  %v265_v20 = vld [vmem:[%s3632_s1 + $0x580] sm:$0xff]  ;;  %v311_v24 = vld [vmem:[%s3632_s1 + $0x6f0] sm:$0xff] }
  0x5f   :  { %883 = vmatpush.msra.mxu0 %v221_v55  ;;  %906 = vmatpush.msra.mxu1 %v237_v56  ;;  %v26_v22 = vld [vmem:[%s3631_s0 + $0x58] sm:$0xff]  ;;  %v327_v25 = vld [vmem:[%s3632_s1 + $0x770] sm:$0xff]  ;;  %v294_v27 = vld [vmem:[%s3632_s1 + $0x668] sm:$0xff] }
  0x60   :  { %929 = vmatpush.msra.mxu2 %v253_v57  ;;  %951 = vmatpush.msra.mxu3 %v270_v58  ;;  %v344_v26 = vld [vmem:[%s3632_s1 + $0x7f8] sm:$0xff]  ;;  %v310_v28 = vld [vmem:[%s3632_s1 + $0x6e8] sm:$0xff]  ;;  %v343_v30 = vld [vmem:[%s3632_s1 + $0x7f0] sm:$0xff] }
  0x61   :  { %799 = vmatmul.f32.gmra.mxu0 %v56_v59  ;;  %845 = vmatmul.f32.gmra.mxu2 %v58_v60  ;;  %v326_v29 = vld [vmem:[%s3632_s1 + $0x768] sm:$0xff]  ;;  %v293_v31 = vld [vmem:[%s3632_s1 + $0x660] sm:$0xff]  ;;  %v62_v36 = vld [vmem:[%s3631_s0 + $0x178] sm:$0xff] }
  0x62   :  { %884 = vmatpush.msra.mxu0 %v220_v61  ;;  %907 = vmatpush.msra.mxu1 %v236_v62  ;;  %v309_v32 = vld [vmem:[%s3632_s1 + $0x6e0] sm:$0xff]  ;;  %v342_v34 = vld [vmem:[%s3632_s1 + $0x7e8] sm:$0xff]  ;;  %v292_v37 = vld [vmem:[%s3632_s1 + $0x658] sm:$0xff] }
  0x63   :  { %930 = vmatpush.msra.mxu2 %v252_v63  ;;  %952 = vmatpush.msra.mxu3 %v269_v0  ;;  %v325_v33 = vld [vmem:[%s3632_s1 + $0x760] sm:$0xff]  ;;  %v60_v35 = vld [vmem:[%s3631_s0 + $0x168] sm:$0xff]  ;;  %v308_v38 = vld [vmem:[%s3632_s1 + $0x6d8] sm:$0xff] }
  0x64   :  { %822 = vmatmul.f32.gmra.mxu1 %v57_v1  ;;  %868 = vmatmul.f32.gmra.mxu3 %v59_v2  ;;  %v324_v39 = vld [vmem:[%s3632_s1 + $0x758] sm:$0xff]  ;;  %v341_v40 = vld [vmem:[%s3632_s1 + $0x7e0] sm:$0xff]  ;;  %v61_v41 = vld [vmem:[%s3631_s0 + $0x170] sm:$0xff] }
  0x65   :  { %885 = vmatpush.msra.mxu0 %v219_v3  ;;  %908 = vmatpush.msra.mxu1 %v235_v4  ;;  %v63_v42 = vld [vmem:[%s3631_s0 + $0x180] sm:$0xff]  ;;  %v291_v43 = vld [vmem:[%s3632_s1 + $0x650] sm:$0xff]  ;;  %v340_v46 = vld [vmem:[%s3632_s1 + $0x7d8] sm:$0xff] }
  0x66   :  { %931 = vmatpush.msra.mxu2 %v251_v5  ;;  %953 = vmatpush.msra.mxu3 %v268_v6  ;;  %v307_v44 = vld [vmem:[%s3632_s1 + $0x6d0] sm:$0xff]  ;;  %v290_v47 = vld [vmem:[%s3632_s1 + $0x648] sm:$0xff]  ;;  %v289_v51 = vld [vmem:[%s3632_s1 + $0x640] sm:$0xff] }
  0x67   :  { %886 = vmatpush.msra.mxu0 %v218_v7  ;;  %909 = vmatpush.msra.mxu1 %v234_v8  ;;  %v323_v45 = vld [vmem:[%s3632_s1 + $0x750] sm:$0xff]  ;;  %v306_v48 = vld [vmem:[%s3632_s1 + $0x6c8] sm:$0xff]  ;;  %v305_v52 = vld [vmem:[%s3632_s1 + $0x6c0] sm:$0xff] }
  0x68   :  { %932 = vmatpush.msra.mxu2 %v250_v9  ;;  %954 = vmatpush.msra.mxu3 %v267_v10  ;;  %v322_v49 = vld [vmem:[%s3632_s1 + $0x748] sm:$0xff]  ;;  %v339_v50 = vld [vmem:[%s3632_s1 + $0x7d0] sm:$0xff]  ;;  %v321_v53 = vld [vmem:[%s3632_s1 + $0x740] sm:$0xff] }
  0x69   :  { %887 = vmatpush.msra.mxu0 %v217_v11  ;;  %910 = vmatpush.msra.mxu1 %v233_v12  ;;  %v338_v54 = vld [vmem:[%s3632_s1 + $0x7c8] sm:$0xff]  ;;  %v288_v55 = vld [vmem:[%s3632_s1 + $0x638] sm:$0xff]  ;;  %v337_v58 = vld [vmem:[%s3632_s1 + $0x7c0] sm:$0xff] }
  0x6a   :  { %933 = vmatpush.msra.mxu2 %v249_v13  ;;  %955 = vmatpush.msra.mxu3 %v266_v14  ;;  %v304_v56 = vld [vmem:[%s3632_s1 + $0x6b8] sm:$0xff]  ;;  %v287_v59 = vld [vmem:[%s3632_s1 + $0x630] sm:$0xff]  ;;  %v286_v63 = vld [vmem:[%s3632_s1 + $0x628] sm:$0xff] }
  0x6b   :  { %888 = vmatmul.f32.vlgmr.msra.gmra.mxu0 %v23_v15  ;;  %934 = vmatmul.f32.vlgmr.msra.gmra.mxu2 %v25_v16  ;;  %v320_v57 = vld [vmem:[%s3632_s1 + $0x738] sm:$0xff]  ;;  %v303_v60 = vld [vmem:[%s3632_s1 + $0x6b0] sm:$0xff]  ;;  %v302_v0 = vld [vmem:[%s3632_s1 + $0x6a8] sm:$0xff] }
  0x6c   :  { %964 = vmatpush.msrb.mxu0 %v296_v17  ;;  %987 = vmatpush.msrb.mxu1 %v312_v18  ;;  %v319_v61 = vld [vmem:[%s3632_s1 + $0x730] sm:$0xff]  ;;  %v336_v62 = vld [vmem:[%s3632_s1 + $0x7b8] sm:$0xff]  ;;  %v318_v1 = vld [vmem:[%s3632_s1 + $0x728] sm:$0xff] }
  0x6d   :  { %1010 = vmatpush.msrb.mxu2 %v328_v19  ;;  %956 = vmatpush.msra.mxu3 %v265_v20  ;;  %v335_v2 = vld [vmem:[%s3632_s1 + $0x7b0] sm:$0xff]  ;;  %v285_v3 = vld [vmem:[%s3632_s1 + $0x620] sm:$0xff]  ;;  %v334_v6 = vld [vmem:[%s3632_s1 + $0x7a8] sm:$0xff] }
  0x6e   :  { %911 = vmatmul.f32.vlgmr.msra.gmra.mxu1 %v24_v21  ;;  %957 = vmatmul.f32.vlgmr.msra.gmra.mxu3 %v26_v22  ;;  %v301_v4 = vld [vmem:[%s3632_s1 + $0x6a0] sm:$0xff]  ;;  %v284_v7 = vld [vmem:[%s3632_s1 + $0x618] sm:$0xff]  ;;  %v283_v11 = vld [vmem:[%s3632_s1 + $0x610] sm:$0xff] }
  0x6f   :  { %965 = vmatpush.msrb.mxu0 %v295_v23  ;;  %988 = vmatpush.msrb.mxu1 %v311_v24  ;;  %v317_v5 = vld [vmem:[%s3632_s1 + $0x720] sm:$0xff]  ;;  %v300_v8 = vld [vmem:[%s3632_s1 + $0x698] sm:$0xff]  ;;  %v299_v12 = vld [vmem:[%s3632_s1 + $0x690] sm:$0xff] }
  0x70   :  { %1011 = vmatpush.msrb.mxu2 %v327_v25  ;;  %1033 = vmatpush.msrb.mxu3 %v344_v26  ;;  %v316_v9 = vld [vmem:[%s3632_s1 + $0x718] sm:$0xff]  ;;  %v333_v10 = vld [vmem:[%s3632_s1 + $0x7a0] sm:$0xff]  ;;  %v315_v13 = vld [vmem:[%s3632_s1 + $0x710] sm:$0xff] }
  0x71   :  { %966 = vmatpush.msrb.mxu0 %v294_v27  ;;  %989 = vmatpush.msrb.mxu1 %v310_v28  ;;  %v332_v14 = vld [vmem:[%s3632_s1 + $0x798] sm:$0xff]  ;;  %v282_v15 = vld [vmem:[%s3632_s1 + $0x608] sm:$0xff]  ;;  %v331_v18 = vld [vmem:[%s3632_s1 + $0x790] sm:$0xff] }
  0x72   :  { %1012 = vmatpush.msrb.mxu2 %v326_v29  ;;  %1034 = vmatpush.msrb.mxu3 %v343_v30  ;;  %v298_v16 = vld [vmem:[%s3632_s1 + $0x688] sm:$0xff]  ;;  %v281_v19 = vld [vmem:[%s3632_s1 + $0x600] sm:$0xff]  ;;  %v29_v24 = vld [vmem:[%s3631_s0 + $0x70] sm:$0xff] }
  0x73   :  { %967 = vmatpush.msrb.mxu0 %v293_v31  ;;  %990 = vmatpush.msrb.mxu1 %v309_v32  ;;  %v314_v17 = vld [vmem:[%s3632_s1 + $0x708] sm:$0xff]  ;;  %v297_v20 = vld [vmem:[%s3632_s1 + $0x680] sm:$0xff]  ;;  %v360_v25 = vld [vmem:[%s3632_s1 + $0x878] sm:$0xff] }
  0x74   :  { %1013 = vmatpush.msrb.mxu2 %v325_v33  ;;  %1035 = vmatpush.msrb.mxu3 %v342_v34  ;;  %v313_v21 = vld [vmem:[%s3632_s1 + $0x700] sm:$0xff]  ;;  %v330_v22 = vld [vmem:[%s3632_s1 + $0x788] sm:$0xff]  ;;  %v376_v26 = vld [vmem:[%s3632_s1 + $0x8f8] sm:$0xff] }
  0x75   :  { %891 = vmatmul.f32.gmra.mxu0 %v60_v35  ;;  %937 = vmatmul.f32.gmra.mxu2 %v62_v36  ;;  %v27_v23 = vld [vmem:[%s3631_s0 + $0x60] sm:$0xff]  ;;  %v392_v27 = vld [vmem:[%s3632_s1 + $0x978] sm:$0xff]  ;;  %v28_v29 = vld [vmem:[%s3631_s0 + $0x68] sm:$0xff] }
  0x76   :  { %968 = vmatpush.msrb.mxu0 %v292_v37  ;;  %991 = vmatpush.msrb.mxu1 %v308_v38  ;;  %v329_v28 = vld [vmem:[%s3632_s1 + $0x780] sm:$0xff]  ;;  %v30_v30 = vld [vmem:[%s3631_s0 + $0x78] sm:$0xff]  ;;  %v359_v31 = vld [vmem:[%s3632_s1 + $0x870] sm:$0xff] }
  0x77   :  { %1014 = vmatpush.msrb.mxu2 %v324_v39  ;;  %1036 = vmatpush.msrb.mxu3 %v341_v40  ;;  %v375_v32 = vld [vmem:[%s3632_s1 + $0x8f0] sm:$0xff]  ;;  %v408_v34 = vld [vmem:[%s3632_s1 + $0x9f8] sm:$0xff]  ;;  %v358_v35 = vld [vmem:[%s3632_s1 + $0x868] sm:$0xff] }
  0x78   :  { %914 = vmatmul.f32.gmra.mxu1 %v61_v41  ;;  %960 = vmatmul.f32.gmra.mxu3 %v63_v42  ;;  %v391_v33 = vld [vmem:[%s3632_s1 + $0x970] sm:$0xff]  ;;  %v374_v36 = vld [vmem:[%s3632_s1 + $0x8e8] sm:$0xff]  ;;  %v357_v39 = vld [vmem:[%s3632_s1 + $0x860] sm:$0xff] }
  0x79   :  { %969 = vmatpush.msrb.mxu0 %v291_v43  ;;  %992 = vmatpush.msrb.mxu1 %v307_v44  ;;  %v390_v37 = vld [vmem:[%s3632_s1 + $0x968] sm:$0xff]  ;;  %v407_v38 = vld [vmem:[%s3632_s1 + $0x9f0] sm:$0xff]  ;;  %v373_v40 = vld [vmem:[%s3632_s1 + $0x8e0] sm:$0xff] }
  0x7a   :  { %1015 = vmatpush.msrb.mxu2 %v323_v45  ;;  %1037 = vmatpush.msrb.mxu3 %v340_v46  ;;  %v389_v41 = vld [vmem:[%s3632_s1 + $0x960] sm:$0xff]  ;;  %v406_v42 = vld [vmem:[%s3632_s1 + $0x9e8] sm:$0xff]  ;;  %v66_v44 = vld [vmem:[%s3631_s0 + $0x198] sm:$0xff] }
  0x7b   :  { %970 = vmatpush.msrb.mxu0 %v290_v47  ;;  %993 = vmatpush.msrb.mxu1 %v306_v48  ;;  %v64_v43 = vld [vmem:[%s3631_s0 + $0x188] sm:$0xff]  ;;  %v356_v45 = vld [vmem:[%s3632_s1 + $0x858] sm:$0xff]  ;;  %v405_v48 = vld [vmem:[%s3632_s1 + $0x9e0] sm:$0xff] }
  0x7c   :  { %1016 = vmatpush.msrb.mxu2 %v322_v49  ;;  %1038 = vmatpush.msrb.mxu3 %v339_v50  ;;  %v372_v46 = vld [vmem:[%s3632_s1 + $0x8d8] sm:$0xff]  ;;  %v65_v49 = vld [vmem:[%s3631_s0 + $0x190] sm:$0xff]  ;;  %v67_v50 = vld [vmem:[%s3631_s0 + $0x1a0] sm:$0xff] }
  0x7d   :  { %971 = vmatpush.msrb.mxu0 %v289_v51  ;;  %994 = vmatpush.msrb.mxu1 %v305_v52  ;;  %v388_v47 = vld [vmem:[%s3632_s1 + $0x958] sm:$0xff]  ;;  %v355_v51 = vld [vmem:[%s3632_s1 + $0x850] sm:$0xff] }
  0x7e   :  { %1017 = vmatpush.msrb.mxu2 %v321_v53  ;;  %1039 = vmatpush.msrb.mxu3 %v338_v54  ;;  %v371_v52 = vld [vmem:[%s3632_s1 + $0x8d0] sm:$0xff]  ;;  %v404_v54 = vld [vmem:[%s3632_s1 + $0x9d8] sm:$0xff] }
  0x7f   :  { %972 = vmatpush.msrb.mxu0 %v288_v55  ;;  %995 = vmatpush.msrb.mxu1 %v304_v56  ;;  %v387_v53 = vld [vmem:[%s3632_s1 + $0x950] sm:$0xff]  ;;  %v354_v55 = vld [vmem:[%s3632_s1 + $0x848] sm:$0xff] }
  0x80   :  { %1018 = vmatpush.msrb.mxu2 %v320_v57  ;;  %1040 = vmatpush.msrb.mxu3 %v337_v58  ;;  %v370_v56 = vld [vmem:[%s3632_s1 + $0x8c8] sm:$0xff]  ;;  %v403_v58 = vld [vmem:[%s3632_s1 + $0x9d0] sm:$0xff] }
  0x81   :  { %973 = vmatpush.msrb.mxu0 %v287_v59  ;;  %996 = vmatpush.msrb.mxu1 %v303_v60  ;;  %v386_v57 = vld [vmem:[%s3632_s1 + $0x948] sm:$0xff]  ;;  %v353_v59 = vld [vmem:[%s3632_s1 + $0x840] sm:$0xff] }
  0x82   :  { %1019 = vmatpush.msrb.mxu2 %v319_v61  ;;  %1041 = vmatpush.msrb.mxu3 %v336_v62  ;;  %v369_v60 = vld [vmem:[%s3632_s1 + $0x8c0] sm:$0xff]  ;;  %v402_v62 = vld [vmem:[%s3632_s1 + $0x9c8] sm:$0xff] }
  0x83   :  { %974 = vmatpush.msrb.mxu0 %v286_v63  ;;  %997 = vmatpush.msrb.mxu1 %v302_v0  ;;  %v385_v61 = vld [vmem:[%s3632_s1 + $0x940] sm:$0xff]  ;;  %v352_v63 = vld [vmem:[%s3632_s1 + $0x838] sm:$0xff] }
  0x84   :  { %1020 = vmatpush.msrb.mxu2 %v318_v1  ;;  %1042 = vmatpush.msrb.mxu3 %v335_v2  ;;  %v368_v0 = vld [vmem:[%s3632_s1 + $0x8b8] sm:$0xff]  ;;  %v401_v2 = vld [vmem:[%s3632_s1 + $0x9c0] sm:$0xff] }
  0x85   :  { %975 = vmatpush.msrb.mxu0 %v285_v3  ;;  %998 = vmatpush.msrb.mxu1 %v301_v4  ;;  %v384_v1 = vld [vmem:[%s3632_s1 + $0x938] sm:$0xff]  ;;  %v351_v3 = vld [vmem:[%s3632_s1 + $0x830] sm:$0xff] }
  0x86   :  { %1021 = vmatpush.msrb.mxu2 %v317_v5  ;;  %1043 = vmatpush.msrb.mxu3 %v334_v6  ;;  %v367_v4 = vld [vmem:[%s3632_s1 + $0x8b0] sm:$0xff]  ;;  %v400_v6 = vld [vmem:[%s3632_s1 + $0x9b8] sm:$0xff] }
  0x87   :  { %976 = vmatpush.msrb.mxu0 %v284_v7  ;;  %999 = vmatpush.msrb.mxu1 %v300_v8  ;;  %v383_v5 = vld [vmem:[%s3632_s1 + $0x930] sm:$0xff]  ;;  %v350_v7 = vld [vmem:[%s3632_s1 + $0x828] sm:$0xff] }
  0x88   :  { %1022 = vmatpush.msrb.mxu2 %v316_v9  ;;  %1044 = vmatpush.msrb.mxu3 %v333_v10  ;;  %v366_v8 = vld [vmem:[%s3632_s1 + $0x8a8] sm:$0xff]  ;;  %v399_v10 = vld [vmem:[%s3632_s1 + $0x9b0] sm:$0xff] }
  0x89   :  { %977 = vmatpush.msrb.mxu0 %v283_v11  ;;  %1000 = vmatpush.msrb.mxu1 %v299_v12  ;;  %v382_v9 = vld [vmem:[%s3632_s1 + $0x928] sm:$0xff]  ;;  %v349_v11 = vld [vmem:[%s3632_s1 + $0x820] sm:$0xff] }
  0x8a   :  { %1023 = vmatpush.msrb.mxu2 %v315_v13  ;;  %1045 = vmatpush.msrb.mxu3 %v332_v14  ;;  %v365_v12 = vld [vmem:[%s3632_s1 + $0x8a0] sm:$0xff]  ;;  %v398_v14 = vld [vmem:[%s3632_s1 + $0x9a8] sm:$0xff] }
  0x8b   :  { %978 = vmatpush.msrb.mxu0 %v282_v15  ;;  %1001 = vmatpush.msrb.mxu1 %v298_v16  ;;  %v381_v13 = vld [vmem:[%s3632_s1 + $0x920] sm:$0xff]  ;;  %v348_v15 = vld [vmem:[%s3632_s1 + $0x818] sm:$0xff] }
  0x8c   :  { %1024 = vmatpush.msrb.mxu2 %v314_v17  ;;  %1046 = vmatpush.msrb.mxu3 %v331_v18  ;;  %v364_v16 = vld [vmem:[%s3632_s1 + $0x898] sm:$0xff]  ;;  %v397_v18 = vld [vmem:[%s3632_s1 + $0x9a0] sm:$0xff] }
  0x8d   :  { %979 = vmatpush.msrb.mxu0 %v281_v19  ;;  %1002 = vmatpush.msrb.mxu1 %v297_v20  ;;  %v380_v17 = vld [vmem:[%s3632_s1 + $0x918] sm:$0xff]  ;;  %v347_v19 = vld [vmem:[%s3632_s1 + $0x810] sm:$0xff] }
  0x8e   :  { %1025 = vmatpush.msrb.mxu2 %v313_v21  ;;  %1047 = vmatpush.msrb.mxu3 %v330_v22  ;;  %v363_v20 = vld [vmem:[%s3632_s1 + $0x890] sm:$0xff]  ;;  %v396_v22 = vld [vmem:[%s3632_s1 + $0x998] sm:$0xff] }
  0x8f   :  { %980 = vmatmul.f32.vlgmr.msrb.gmra.mxu0 %v27_v23  ;;  %1026 = vmatmul.f32.vlgmr.msrb.gmra.mxu2 %v29_v24  ;;  %v379_v21 = vld [vmem:[%s3632_s1 + $0x910] sm:$0xff]  ;;  %v346_v23 = vld [vmem:[%s3632_s1 + $0x808] sm:$0xff] }
  0x90   :  { %1056 = vmatpush.msra.mxu0 %v360_v25  ;;  %1079 = vmatpush.msra.mxu1 %v376_v26  ;;  %v362_v24 = vld [vmem:[%s3632_s1 + $0x888] sm:$0xff]  ;;  %v395_v26 = vld [vmem:[%s3632_s1 + $0x990] sm:$0xff] }
  0x91   :  { %1102 = vmatpush.msra.mxu2 %v392_v27  ;;  %1048 = vmatpush.msrb.mxu3 %v329_v28  ;;  %v378_v25 = vld [vmem:[%s3632_s1 + $0x908] sm:$0xff]  ;;  %v345_v27 = vld [vmem:[%s3632_s1 + $0x800] sm:$0xff] }
  0x92   :  { %1003 = vmatmul.f32.vlgmr.msrb.gmra.mxu1 %v28_v29  ;;  %1049 = vmatmul.f32.vlgmr.msrb.gmra.mxu3 %v30_v30  ;;  %v361_v28 = vld [vmem:[%s3632_s1 + $0x880] sm:$0xff]  ;;  %v394_v30 = vld [vmem:[%s3632_s1 + $0x988] sm:$0xff] }
  0x93   :  { %1057 = vmatpush.msra.mxu0 %v359_v31  ;;  %1080 = vmatpush.msra.mxu1 %v375_v32  ;;  %v377_v29 = vld [vmem:[%s3632_s1 + $0x900] sm:$0xff]  ;;  %v33_v32 = vld [vmem:[%s3631_s0 + $0x90] sm:$0xff] }
  0x94   :  { %1103 = vmatpush.msra.mxu2 %v391_v33  ;;  %1125 = vmatpush.msra.mxu3 %v408_v34  ;;  %v31_v31 = vld [vmem:[%s3631_s0 + $0x80] sm:$0xff]  ;;  %v424_v33 = vld [vmem:[%s3632_s1 + $0xa78] sm:$0xff] }
  0x95   :  { %1058 = vmatpush.msra.mxu0 %v358_v35  ;;  %1081 = vmatpush.msra.mxu1 %v374_v36  ;;  %v440_v34 = vld [vmem:[%s3632_s1 + $0xaf8] sm:$0xff]  ;;  %v393_v36 = vld [vmem:[%s3632_s1 + $0x980] sm:$0xff] }
  0x96   :  { %1104 = vmatpush.msra.mxu2 %v390_v37  ;;  %1126 = vmatpush.msra.mxu3 %v407_v38  ;;  %v456_v35 = vld [vmem:[%s3632_s1 + $0xb78] sm:$0xff]  ;;  %v32_v37 = vld [vmem:[%s3631_s0 + $0x88] sm:$0xff] }
  0x97   :  { %1059 = vmatpush.msra.mxu0 %v357_v39  ;;  %1082 = vmatpush.msra.mxu1 %v373_v40  ;;  %v34_v38 = vld [vmem:[%s3631_s0 + $0x98] sm:$0xff]  ;;  %v2706_v39 = vld [vmem:[%s3633_s2] ss:$0 sm:$0xff]  ;;  %v423_v40 = vld [vmem:[%s3632_s1 + $0xa70] sm:$0xff] }
  0x98   :  { %1105 = vmatpush.msra.mxu2 %v389_v41  ;;  %1127 = vmatpush.msra.mxu3 %v406_v42  ;;  %v439_v41 = vld [vmem:[%s3632_s1 + $0xaf0] sm:$0xff] }
  0x99   :  { %983 = vmatmul.f32.gmra.mxu0 %v64_v43  ;;  %1029 = vmatmul.f32.gmra.mxu2 %v66_v44  ;;  %v455_v42 = vld [vmem:[%s3632_s1 + $0xb70] sm:$0xff]  ;;  %v472_v43 = vld [vmem:[%s3632_s1 + $0xbf8] sm:$0xff]  ;;  %v422_v44 = vld [vmem:[%s3632_s1 + $0xa68] sm:$0xff] }
  0x9a   :  { %1060 = vmatpush.msra.mxu0 %v356_v45  ;;  %1083 = vmatpush.msra.mxu1 %v372_v46  ;;  %v438_v45 = vld [vmem:[%s3632_s1 + $0xae8] sm:$0xff] }
  0x9b   :  { %1106 = vmatpush.msra.mxu2 %v388_v47  ;;  %1128 = vmatpush.msra.mxu3 %v405_v48  ;;  %v454_v47 = vld [vmem:[%s3632_s1 + $0xb68] sm:$0xff]  ;;  %v471_v48 = vld [vmem:[%s3632_s1 + $0xbf0] sm:$0xff] }
  0x9c   :  { %1006 = vmatmul.f32.gmra.mxu1 %v65_v49  ;;  %1052 = vmatmul.f32.gmra.mxu3 %v67_v50  ;;  %v421_v50 = vld [vmem:[%s3632_s1 + $0xa60] sm:$0xff] }
  0x9d   :  { %1061 = vmatpush.msra.mxu0 %v355_v51  ;;  %1084 = vmatpush.msra.mxu1 %v371_v52  ;;  %v437_v51 = vld [vmem:[%s3632_s1 + $0xae0] sm:$0xff] }
  0x9e   :  { %1107 = vmatpush.msra.mxu2 %v387_v53  ;;  %1129 = vmatpush.msra.mxu3 %v404_v54  ;;  %v453_v52 = vld [vmem:[%s3632_s1 + $0xb60] sm:$0xff]  ;;  %v470_v53 = vld [vmem:[%s3632_s1 + $0xbe8] sm:$0xff] }
  0x9f   :  { %1062 = vmatpush.msra.mxu0 %v354_v55  ;;  %1085 = vmatpush.msra.mxu1 %v370_v56  ;;  %v68_v55 = vld [vmem:[%s3631_s0 + $0x1a8] sm:$0xff]  ;;  %v70_v56 = vld [vmem:[%s3631_s0 + $0x1b8] sm:$0xff] }
  0xa0   :  { %1108 = vmatpush.msra.mxu2 %v386_v57  ;;  %1130 = vmatpush.msra.mxu3 %v403_v58  ;;  %v420_v58 = vld [vmem:[%s3632_s1 + $0xa58] sm:$0xff] }
  0xa1   :  { %1063 = vmatpush.msra.mxu0 %v353_v59  ;;  %1086 = vmatpush.msra.mxu1 %v369_v60  ;;  %v436_v59 = vld [vmem:[%s3632_s1 + $0xad8] sm:$0xff] }
  0xa2   :  { %1109 = vmatpush.msra.mxu2 %v385_v61  ;;  %1131 = vmatpush.msra.mxu3 %v402_v62  ;;  %v452_v61 = vld [vmem:[%s3632_s1 + $0xb58] sm:$0xff]  ;;  %v469_v62 = vld [vmem:[%s3632_s1 + $0xbe0] sm:$0xff] }
  0xa3   :  { %1064 = vmatpush.msra.mxu0 %v352_v63  ;;  %1087 = vmatpush.msra.mxu1 %v368_v0  ;;  %v69_v0 = vld [vmem:[%s3631_s0 + $0x1b0] sm:$0xff] }
  0xa4   :  { %1110 = vmatpush.msra.mxu2 %v384_v1  ;;  %1132 = vmatpush.msra.mxu3 %v401_v2  ;;  %v71_v1 = vld [vmem:[%s3631_s0 + $0x1c0] sm:$0xff] }
  0xa5   :  { %1065 = vmatpush.msra.mxu0 %v351_v3  ;;  %1088 = vmatpush.msra.mxu1 %v367_v4  ;;  %v419_v3 = vld [vmem:[%s3632_s1 + $0xa50] sm:$0xff] }
  0xa6   :  { %1111 = vmatpush.msra.mxu2 %v383_v5  ;;  %1133 = vmatpush.msra.mxu3 %v400_v6  ;;  %v435_v4 = vld [vmem:[%s3632_s1 + $0xad0] sm:$0xff] }
  0xa7   :  { %1066 = vmatpush.msra.mxu0 %v350_v7  ;;  %1089 = vmatpush.msra.mxu1 %v366_v8  ;;  %v451_v6 = vld [vmem:[%s3632_s1 + $0xb50] sm:$0xff]  ;;  %v468_v7 = vld [vmem:[%s3632_s1 + $0xbd8] sm:$0xff]  ;;  %v418_v8 = vld [vmem:[%s3632_s1 + $0xa48] sm:$0xff] }
  0xa8   :  { %1112 = vmatpush.msra.mxu2 %v382_v9  ;;  %1134 = vmatpush.msra.mxu3 %v399_v10  ;;  %v434_v9 = vld [vmem:[%s3632_s1 + $0xac8] sm:$0xff] }
  0xa9   :  { %1067 = vmatpush.msra.mxu0 %v349_v11  ;;  %1090 = vmatpush.msra.mxu1 %v365_v12  ;;  %v450_v11 = vld [vmem:[%s3632_s1 + $0xb48] sm:$0xff]  ;;  %v467_v12 = vld [vmem:[%s3632_s1 + $0xbd0] sm:$0xff] }
  0xaa   :  { %1113 = vmatpush.msra.mxu2 %v381_v13  ;;  %1135 = vmatpush.msra.mxu3 %v398_v14  ;;  %v417_v14 = vld [vmem:[%s3632_s1 + $0xa40] sm:$0xff] }
  0xab   :  { %1068 = vmatpush.msra.mxu0 %v348_v15  ;;  %1091 = vmatpush.msra.mxu1 %v364_v16  ;;  %v433_v15 = vld [vmem:[%s3632_s1 + $0xac0] sm:$0xff] }
  0xac   :  { %1114 = vmatpush.msra.mxu2 %v380_v17  ;;  %1136 = vmatpush.msra.mxu3 %v397_v18  ;;  %v449_v16 = vld [vmem:[%s3632_s1 + $0xb40] sm:$0xff]  ;;  %v466_v17 = vld [vmem:[%s3632_s1 + $0xbc8] sm:$0xff] }
  0xad   :  { %1069 = vmatpush.msra.mxu0 %v347_v19  ;;  %1092 = vmatpush.msra.mxu1 %v363_v20  ;;  %v416_v19 = vld [vmem:[%s3632_s1 + $0xa38] sm:$0xff] }
  0xae   :  { %1115 = vmatpush.msra.mxu2 %v379_v21  ;;  %1137 = vmatpush.msra.mxu3 %v396_v22  ;;  %v432_v20 = vld [vmem:[%s3632_s1 + $0xab8] sm:$0xff] }
  0xaf   :  { %1070 = vmatpush.msra.mxu0 %v346_v23  ;;  %1093 = vmatpush.msra.mxu1 %v362_v24  ;;  %v448_v22 = vld [vmem:[%s3632_s1 + $0xb38] sm:$0xff]  ;;  %v465_v23 = vld [vmem:[%s3632_s1 + $0xbc0] sm:$0xff] }
  0xb0   :  { %1116 = vmatpush.msra.mxu2 %v378_v25  ;;  %1138 = vmatpush.msra.mxu3 %v395_v26  ;;  %v415_v25 = vld [vmem:[%s3632_s1 + $0xa30] sm:$0xff] }
  0xb1   :  { %1071 = vmatpush.msra.mxu0 %v345_v27  ;;  %1094 = vmatpush.msra.mxu1 %v361_v28  ;;  %v431_v26 = vld [vmem:[%s3632_s1 + $0xab0] sm:$0xff] }
  0xb2   :  { %1117 = vmatpush.msra.mxu2 %v377_v29  ;;  %1139 = vmatpush.msra.mxu3 %v394_v30  ;;  %v447_v28 = vld [vmem:[%s3632_s1 + $0xb30] sm:$0xff]  ;;  %v464_v29 = vld [vmem:[%s3632_s1 + $0xbb8] sm:$0xff] }
  0xb3   :  { %1072 = vmatmul.f32.vlgmr.msra.gmra.mxu0 %v31_v31  ;;  %1118 = vmatmul.f32.vlgmr.msra.gmra.mxu2 %v33_v32  ;;  %v414_v31 = vld [vmem:[%s3632_s1 + $0xa28] sm:$0xff] }
  0xb4   :  { %1148 = vmatpush.msrb.mxu0 %v424_v33  ;;  %1171 = vmatpush.msrb.mxu1 %v440_v34  ;;  %v430_v32 = vld [vmem:[%s3632_s1 + $0xaa8] sm:$0xff] }
  0xb5   :  { %1194 = vmatpush.msrb.mxu2 %v456_v35  ;;  %1140 = vmatpush.msra.mxu3 %v393_v36  ;;  %v446_v34 = vld [vmem:[%s3632_s1 + $0xb28] sm:$0xff]  ;;  %v463_v35 = vld [vmem:[%s3632_s1 + $0xbb0] sm:$0xff]  ;;  %v413_v36 = vld [vmem:[%s3632_s1 + $0xa20] sm:$0xff] }
  0xb6   :  { %1095 = vmatmul.f32.vlgmr.msra.gmra.mxu1 %v32_v37  ;;  %1141 = vmatmul.f32.vlgmr.msra.gmra.mxu3 %v34_v38  ;;  %v705_v46 = vpop.f32.mrf.mxu0  ;;  %v429_v37 = vld [vmem:[%s3632_s1 + $0xaa0] sm:$0xff] }
  0xb7   :  { %1149 = vmatpush.msrb.mxu0 %v423_v40  ;;  %1172 = vmatpush.msrb.mxu1 %v439_v41  ;;  %v706_v49 = vadd.f32 %v2706_v39, %v705_v46  ;;  %v462_v40 = vld [vmem:[%s3632_s1 + $0xba8] sm:$0xff] }
  0xb8   :  { %1195 = vmatpush.msrb.mxu2 %v455_v42  ;;  %1217 = vmatpush.msrb.mxu3 %v472_v43  ;;  %v412_v42 = vld [vmem:[%s3632_s1 + $0xa18] sm:$0xff] }
  0xb9   :  { %1150 = vmatpush.msrb.mxu0 %v422_v44  ;;  %1173 = vmatpush.msrb.mxu1 %v438_v45  ;;  %v728_v54 = vpop.f32.mrf.mxu1  ;;  %v428_v43 = vld [vmem:[%s3632_s1 + $0xa98] sm:$0xff]  ;;  %v461_v45 = vld [vmem:[%s3632_s1 + $0xba0] sm:$0xff] }
  0xba   :  { %1196 = vmatpush.msrb.mxu2 %v454_v47  ;;  %1218 = vmatpush.msrb.mxu3 %v471_v48  ;;  %v729_v57 = vadd.f32 %v728_v54, %v706_v49  ;;  %v751_v60 = vpop.f32.mrf.mxu2  ;;  %v444_v44 = vld [vmem:[%s3632_s1 + $0xb18] sm:$0xff]  ;;  %v411_v47 = vld [vmem:[%s3632_s1 + $0xa10] sm:$0xff]  ;;  %v442_v54 = vld [vmem:[%s3632_s1 + $0xb08] sm:$0xff] }
  0xbb   :  { %1151 = vmatpush.msrb.mxu0 %v421_v50  ;;  %1174 = vmatpush.msrb.mxu1 %v437_v51  ;;  %v427_v48 = vld [vmem:[%s3632_s1 + $0xa90] sm:$0xff]  ;;  %v460_v51 = vld [vmem:[%s3632_s1 + $0xb98] sm:$0xff] }
  0xbc   :  { %1197 = vmatpush.msrb.mxu2 %v453_v52  ;;  %1219 = vmatpush.msrb.mxu3 %v470_v53  ;;  %v752_v63 = vadd.f32 %v751_v60, %v729_v57  ;;  %v774_v2 = vpop.f32.mrf.mxu3  ;;  %v443_v50 = vld [vmem:[%s3632_s1 + $0xb10] sm:$0xff]  ;;  %v410_v52 = vld [vmem:[%s3632_s1 + $0xa08] sm:$0xff]  ;;  %v425_v57 = vld [vmem:[%s3632_s1 + $0xa80] sm:$0xff] }
  0xbd   :  { %1075 = vmatmul.f32.gmra.mxu0 %v68_v55  ;;  %1121 = vmatmul.f32.gmra.mxu2 %v70_v56  ;;  %v426_v53 = vld [vmem:[%s3632_s1 + $0xa88] sm:$0xff]  ;;  %v459_v55 = vld [vmem:[%s3632_s1 + $0xb90] sm:$0xff]  ;;  %v409_v56 = vld [vmem:[%s3632_s1 + $0xa00] sm:$0xff] }
  0xbe   :  { %1152 = vmatpush.msrb.mxu0 %v420_v58  ;;  %1175 = vmatpush.msrb.mxu1 %v436_v59  ;;  %v775_v5 = vadd.f32 %v774_v2, %v752_v63  ;;  %v441_v58 = vld [vmem:[%s3632_s1 + $0xb00] sm:$0xff]  ;;  %v458_v59 = vld [vmem:[%s3632_s1 + $0xb88] sm:$0xff]  ;;  %v504_v63 = vld [vmem:[%s3632_s1 + $0xcf8] sm:$0xff] }
  0xbf   :  { %1198 = vmatpush.msrb.mxu2 %v452_v61  ;;  %1220 = vmatpush.msrb.mxu3 %v469_v62  ;;  %v35_v60 = vld [vmem:[%s3631_s0 + $0xa0] sm:$0xff]  ;;  %v37_v61 = vld [vmem:[%s3631_s0 + $0xb0] sm:$0xff]  ;;  %v488_v62 = vld [vmem:[%s3632_s1 + $0xc78] sm:$0xff] }
  0xc0   :  { %1098 = vmatmul.f32.gmra.mxu1 %v69_v0  ;;  %1144 = vmatmul.f32.gmra.mxu3 %v71_v1  ;;  %v708_v10 = vpop.f32.mrf.mxu0  ;;  %v520_v0 = vld [vmem:[%s3632_s1 + $0xd78] sm:$0xff]  ;;  %v457_v1 = vld [vmem:[%s3632_s1 + $0xb80] sm:$0xff]  ;;  %v36_v2 = vld [vmem:[%s3631_s0 + $0xa8] sm:$0xff] }
  0xc1   :  { %1153 = vmatpush.msrb.mxu0 %v419_v3  ;;  %1176 = vmatpush.msrb.mxu1 %v435_v4  ;;  %v709_v13 = vadd.f32 %v2706_v39, %v708_v10  ;;  %v445_v39 = vld [vmem:[%s3632_s1 + $0xb20] sm:$0xff]  ;;  %v38_v3 = vld [vmem:[%s3631_s0 + $0xb8] sm:$0xff]  ;;  %v487_v4 = vld [vmem:[%s3632_s1 + $0xc70] sm:$0xff] }
  0xc2   :  { %1199 = vmatpush.msrb.mxu2 %v451_v6  ;;  %1221 = vmatpush.msrb.mxu3 %v468_v7  ;;  %v519_v6 = vld [vmem:[%s3632_s1 + $0xd70] sm:$0xff]  ;;  %v536_v7 = vld [vmem:[%s3632_s1 + $0xdf8] sm:$0xff]  ;;  %v518_v10 = vld [vmem:[%s3632_s1 + $0xd68] sm:$0xff] }
  0xc3   :  { %1154 = vmatpush.msrb.mxu0 %v418_v8  ;;  %1177 = vmatpush.msrb.mxu1 %v434_v9  ;;  %v731_v18 = vpop.f32.mrf.mxu1  ;;  %v754_v24 = vpop.f32.mrf.mxu2  ;;  %v486_v8 = vld [vmem:[%s3632_s1 + $0xc68] sm:$0xff] }
  0xc4   :  { %1200 = vmatpush.msrb.mxu2 %v450_v11  ;;  %1222 = vmatpush.msrb.mxu3 %v467_v12  ;;  %v732_v21 = vadd.f32 %v731_v18, %v709_v13  ;;  %v502_v9 = vld [vmem:[%s3632_s1 + $0xce8] sm:$0xff]  ;;  %v535_v11 = vld [vmem:[%s3632_s1 + $0xdf0] sm:$0xff]  ;;  %v485_v12 = vld [vmem:[%s3632_s1 + $0xc60] sm:$0xff] }
  0xc5   :  { %1155 = vmatpush.msrb.mxu0 %v417_v14  ;;  %1178 = vmatpush.msrb.mxu1 %v433_v15  ;;  %v501_v13 = vld [vmem:[%s3632_s1 + $0xce0] sm:$0xff]  ;;  %v534_v15 = vld [vmem:[%s3632_s1 + $0xde8] sm:$0xff]  ;;  %v484_v18 = vld [vmem:[%s3632_s1 + $0xc58] sm:$0xff] }
  0xc6   :  { %1201 = vmatpush.msrb.mxu2 %v449_v16  ;;  %1223 = vmatpush.msrb.mxu3 %v466_v17  ;;  %v755_v27 = vadd.f32 %v754_v24, %v732_v21  ;;  %v517_v14 = vld [vmem:[%s3632_s1 + $0xd60] sm:$0xff]  ;;  %v72_v16 = vld [vmem:[%s3631_s0 + $0x1c8] sm:$0xff]  ;;  %v74_v17 = vld [vmem:[%s3631_s0 + $0x1d8] sm:$0xff] }
  0xc7   :  { %1156 = vmatpush.msrb.mxu0 %v416_v19  ;;  %1179 = vmatpush.msrb.mxu1 %v432_v20  ;;  %v777_v30 = vpop.f32.mrf.mxu3  ;;  %v500_v19 = vld [vmem:[%s3632_s1 + $0xcd8] sm:$0xff]  ;;  %v533_v21 = vld [vmem:[%s3632_s1 + $0xde0] sm:$0xff]  ;;  %v483_v24 = vld [vmem:[%s3632_s1 + $0xc50] sm:$0xff] }
  0xc8   :  { %1202 = vmatpush.msrb.mxu2 %v448_v22  ;;  %1224 = vmatpush.msrb.mxu3 %v465_v23  ;;  %v2836_v33 = vadd.f32 %v777_v30, %v755_v27  ;;  %v516_v20 = vld [vmem:[%s3632_s1 + $0xd58] sm:$0xff]  ;;  %v73_v22 = vld [vmem:[%s3631_s0 + $0x1d0] sm:$0xff]  ;;  %v75_v23 = vld [vmem:[%s3631_s0 + $0x1e0] sm:$0xff] }
  0xc9   :  { %1157 = vmatpush.msrb.mxu0 %v415_v25  ;;  %1180 = vmatpush.msrb.mxu1 %v431_v26  ;;  %v499_v25 = vld [vmem:[%s3632_s1 + $0xcd0] sm:$0xff]  ;;  %v532_v27 = vld [vmem:[%s3632_s1 + $0xdd8] sm:$0xff]  ;;  %v514_v30 = vld [vmem:[%s3632_s1 + $0xd48] sm:$0xff] }
  0xca   :  { %1203 = vmatpush.msrb.mxu2 %v447_v28  ;;  %1225 = vmatpush.msrb.mxu3 %v464_v29  ;;  %v797_v38 = vpop.f32.mrf.mxu0  ;;  %v515_v26 = vld [vmem:[%s3632_s1 + $0xd50] sm:$0xff]  ;;  %v482_v28 = vld [vmem:[%s3632_s1 + $0xc48] sm:$0xff] }
  0xcb   :  { %1158 = vmatpush.msrb.mxu0 %v414_v31  ;;  %1181 = vmatpush.msrb.mxu1 %v430_v32  ;;  %v798_v41 = vadd.f32 %v797_v38, %v775_v5  ;;  %v503_v5 = vld [vmem:[%s3632_s1 + $0xcf0] sm:$0xff]  ;;  %v498_v29 = vld [vmem:[%s3632_s1 + $0xcc8] sm:$0xff]  ;;  %v481_v32 = vld [vmem:[%s3632_s1 + $0xc40] sm:$0xff] }
  0xcc   :  { %1204 = vmatpush.msrb.mxu2 %v446_v34  ;;  %1226 = vmatpush.msrb.mxu3 %v463_v35  ;;  %v531_v31 = vld [vmem:[%s3632_s1 + $0xdd0] sm:$0xff]  ;;  %v497_v34 = vld [vmem:[%s3632_s1 + $0xcc0] sm:$0xff]  ;;  %v496_v38 = vld [vmem:[%s3632_s1 + $0xcb8] sm:$0xff] }
  0xcd   :  { %1159 = vmatpush.msrb.mxu0 %v413_v36  ;;  %1182 = vmatpush.msrb.mxu1 %v429_v37  ;;  %v820_v46 = vpop.f32.mrf.mxu1  ;;  %v513_v35 = vld [vmem:[%s3632_s1 + $0xd40] sm:$0xff]  ;;  %v530_v36 = vld [vmem:[%s3632_s1 + $0xdc8] sm:$0xff]  ;;  %v480_v37 = vld [vmem:[%s3632_s1 + $0xc38] sm:$0xff] }
  0xce   :  { %1205 = vmatpush.msrb.mxu2 %v445_v39  ;;  %1227 = vmatpush.msrb.mxu3 %v462_v40  ;;  %v2874_v49 = vadd.f32 %v820_v46, %v798_v41  ;;  %v512_v39 = vld [vmem:[%s3632_s1 + $0xd38] sm:$0xff]  ;;  %v529_v40 = vld [vmem:[%s3632_s1 + $0xdc0] sm:$0xff]  ;;  %v479_v41 = vld [vmem:[%s3632_s1 + $0xc30] sm:$0xff] }
  0xcf   :  { %1160 = vmatpush.msrb.mxu0 %v412_v42  ;;  %1183 = vmatpush.msrb.mxu1 %v428_v43  ;;  %v495_v42 = vld [vmem:[%s3632_s1 + $0xcb0] sm:$0xff]  ;;  %v494_v46 = vld [vmem:[%s3632_s1 + $0xca8] sm:$0xff] }
  0xd0   :  { %1206 = vmatpush.msrb.mxu2 %v444_v44  ;;  %1228 = vmatpush.msrb.mxu3 %v461_v45  ;;  %v511_v43 = vld [vmem:[%s3632_s1 + $0xd30] sm:$0xff]  ;;  %v528_v44 = vld [vmem:[%s3632_s1 + $0xdb8] sm:$0xff]  ;;  %v478_v45 = vld [vmem:[%s3632_s1 + $0xc28] sm:$0xff] }
  0xd1   :  { %1161 = vmatpush.msrb.mxu0 %v411_v47  ;;  %1184 = vmatpush.msrb.mxu1 %v427_v48  ;;  %v510_v47 = vld [vmem:[%s3632_s1 + $0xd28] sm:$0xff]  ;;  %v527_v48 = vld [vmem:[%s3632_s1 + $0xdb0] sm:$0xff] }
  0xd2   :  { %1207 = vmatpush.msrb.mxu2 %v443_v50  ;;  %1229 = vmatpush.msrb.mxu3 %v460_v51  ;;  %v477_v50 = vld [vmem:[%s3632_s1 + $0xc20] sm:$0xff] }
  0xd3   :  { %1162 = vmatpush.msrb.mxu0 %v410_v52  ;;  %1185 = vmatpush.msrb.mxu1 %v426_v53  ;;  %v493_v51 = vld [vmem:[%s3632_s1 + $0xca0] sm:$0xff]  ;;  %v526_v53 = vld [vmem:[%s3632_s1 + $0xda8] sm:$0xff] }
  0xd4   :  { %1208 = vmatpush.msrb.mxu2 %v442_v54  ;;  %1230 = vmatpush.msrb.mxu3 %v459_v55  ;;  %v509_v52 = vld [vmem:[%s3632_s1 + $0xd20] sm:$0xff]  ;;  %v476_v54 = vld [vmem:[%s3632_s1 + $0xc18] sm:$0xff] }
  0xd5   :  { %1163 = vmatpush.msrb.mxu0 %v409_v56  ;;  %1186 = vmatpush.msrb.mxu1 %v425_v57  ;;  %v492_v55 = vld [vmem:[%s3632_s1 + $0xc98] sm:$0xff]  ;;  %v525_v57 = vld [vmem:[%s3632_s1 + $0xda0] sm:$0xff] }
  0xd6   :  { %1209 = vmatpush.msrb.mxu2 %v441_v58  ;;  %1231 = vmatpush.msrb.mxu3 %v458_v59  ;;  %v508_v56 = vld [vmem:[%s3632_s1 + $0xd18] sm:$0xff]  ;;  %v475_v58 = vld [vmem:[%s3632_s1 + $0xc10] sm:$0xff] }
  0xd7   :  { %1164 = vmatmul.f32.vlgmr.msrb.gmra.mxu0 %v35_v60  ;;  %1210 = vmatmul.f32.vlgmr.msrb.gmra.mxu2 %v37_v61  ;;  %v491_v59 = vld [vmem:[%s3632_s1 + $0xc90] sm:$0xff]  ;;  %v524_v61 = vld [vmem:[%s3632_s1 + $0xd98] sm:$0xff] }
  0xd8   :  { %1240 = vmatpush.msra.mxu0 %v488_v62  ;;  %1263 = vmatpush.msra.mxu1 %v504_v63  ;;  %v507_v60 = vld [vmem:[%s3632_s1 + $0xd10] sm:$0xff]  ;;  %v474_v62 = vld [vmem:[%s3632_s1 + $0xc08] sm:$0xff] }
  0xd9   :  { %1286 = vmatpush.msra.mxu2 %v520_v0  ;;  %1232 = vmatpush.msrb.mxu3 %v457_v1  ;;  %v490_v63 = vld [vmem:[%s3632_s1 + $0xc88] sm:$0xff]  ;;  %v523_v1 = vld [vmem:[%s3632_s1 + $0xd90] sm:$0xff] }
  0xda   :  { %1187 = vmatmul.f32.vlgmr.msrb.gmra.mxu1 %v36_v2  ;;  %1233 = vmatmul.f32.vlgmr.msrb.gmra.mxu3 %v38_v3  ;;  %v506_v0 = vld [vmem:[%s3632_s1 + $0xd08] sm:$0xff]  ;;  %v473_v2 = vld [vmem:[%s3632_s1 + $0xc00] sm:$0xff] }
  0xdb   :  { %1241 = vmatpush.msra.mxu0 %v487_v4  ;;  %1264 = vmatpush.msra.mxu1 %v503_v5  ;;  %v489_v3 = vld [vmem:[%s3632_s1 + $0xc80] sm:$0xff]  ;;  %v522_v5 = vld [vmem:[%s3632_s1 + $0xd88] sm:$0xff] }
  0xdc   :  { %1287 = vmatpush.msra.mxu2 %v519_v6  ;;  %1309 = vmatpush.msra.mxu3 %v536_v7  ;;  %v505_v4 = vld [vmem:[%s3632_s1 + $0xd00] sm:$0xff]  ;;  %v41_v7 = vld [vmem:[%s3631_s0 + $0xd0] sm:$0xff] }
  0xdd   :  { %1242 = vmatpush.msra.mxu0 %v486_v8  ;;  %1265 = vmatpush.msra.mxu1 %v502_v9  ;;  %v39_v6 = vld [vmem:[%s3631_s0 + $0xc0] sm:$0xff]  ;;  %v552_v8 = vld [vmem:[%s3632_s1 + $0xe78] sm:$0xff] }
  0xde   :  { %1288 = vmatpush.msra.mxu2 %v518_v10  ;;  %1310 = vmatpush.msra.mxu3 %v535_v11  ;;  %v568_v9 = vld [vmem:[%s3632_s1 + $0xef8] sm:$0xff]  ;;  %v521_v11 = vld [vmem:[%s3632_s1 + $0xd80] sm:$0xff] }
  0xdf   :  { %1243 = vmatpush.msra.mxu0 %v485_v12  ;;  %1266 = vmatpush.msra.mxu1 %v501_v13  ;;  %v584_v10 = vld [vmem:[%s3632_s1 + $0xf78] sm:$0xff]  ;;  %v40_v12 = vld [vmem:[%s3631_s0 + $0xc8] sm:$0xff] }
  0xe0   :  { %1289 = vmatpush.msra.mxu2 %v517_v14  ;;  %1311 = vmatpush.msra.mxu3 %v534_v15  ;;  %v42_v13 = vld [vmem:[%s3631_s0 + $0xd8] sm:$0xff]  ;;  %v551_v14 = vld [vmem:[%s3632_s1 + $0xe70] sm:$0xff] }
  0xe1   :  { %1167 = vmatmul.f32.gmra.mxu0 %v72_v16  ;;  %1213 = vmatmul.f32.gmra.mxu2 %v74_v17  ;;  %v567_v15 = vld [vmem:[%s3632_s1 + $0xef0] sm:$0xff]  ;;  %v600_v17 = vld [vmem:[%s3632_s1 + $0xff8] sm:$0xff] }
  0xe2   :  { %1244 = vmatpush.msra.mxu0 %v484_v18  ;;  %1267 = vmatpush.msra.mxu1 %v500_v19  ;;  %v583_v16 = vld [vmem:[%s3632_s1 + $0xf70] sm:$0xff]  ;;  %v550_v18 = vld [vmem:[%s3632_s1 + $0xe68] sm:$0xff] }
  0xe3   :  { %1290 = vmatpush.msra.mxu2 %v516_v20  ;;  %1312 = vmatpush.msra.mxu3 %v533_v21  ;;  %v566_v19 = vld [vmem:[%s3632_s1 + $0xee8] sm:$0xff]  ;;  %v599_v21 = vld [vmem:[%s3632_s1 + $0xff0] sm:$0xff] }
  0xe4   :  { %1190 = vmatmul.f32.gmra.mxu1 %v73_v22  ;;  %1236 = vmatmul.f32.gmra.mxu3 %v75_v23  ;;  %v582_v20 = vld [vmem:[%s3632_s1 + $0xf68] sm:$0xff]  ;;  %v549_v22 = vld [vmem:[%s3632_s1 + $0xe60] sm:$0xff] }
  0xe5   :  { %1245 = vmatpush.msra.mxu0 %v483_v24  ;;  %1268 = vmatpush.msra.mxu1 %v499_v25  ;;  %v565_v23 = vld [vmem:[%s3632_s1 + $0xee0] sm:$0xff]  ;;  %v598_v25 = vld [vmem:[%s3632_s1 + $0xfe8] sm:$0xff] }
  0xe6   :  { %1291 = vmatpush.msra.mxu2 %v515_v26  ;;  %1313 = vmatpush.msra.mxu3 %v532_v27  ;;  %v581_v24 = vld [vmem:[%s3632_s1 + $0xf60] sm:$0xff]  ;;  %v76_v26 = vld [vmem:[%s3631_s0 + $0x1e8] sm:$0xff]  ;;  %v78_v27 = vld [vmem:[%s3631_s0 + $0x1f8] sm:$0xff] }
  0xe7   :  { %1246 = vmatpush.msra.mxu0 %v482_v28  ;;  %1269 = vmatpush.msra.mxu1 %v498_v29  ;;  %v548_v28 = vld [vmem:[%s3632_s1 + $0xe58] sm:$0xff] }
  0xe8   :  { %1292 = vmatpush.msra.mxu2 %v514_v30  ;;  %1314 = vmatpush.msra.mxu3 %v531_v31  ;;  %v564_v29 = vld [vmem:[%s3632_s1 + $0xed8] sm:$0xff]  ;;  %v597_v31 = vld [vmem:[%s3632_s1 + $0xfe0] sm:$0xff] }
  0xe9   :  { %1247 = vmatpush.msra.mxu0 %v481_v32  ;;  %1270 = vmatpush.msra.mxu1 %v497_v34  ;;  %v580_v30 = vld [vmem:[%s3632_s1 + $0xf58] sm:$0xff]  ;;  %v77_v32 = vld [vmem:[%s3631_s0 + $0x1f0] sm:$0xff]  ;;  %v79_v34 = vld [vmem:[%s3631_s0 + $0x200] sm:$0xff] }
  0xea   :  { %1293 = vmatpush.msra.mxu2 %v513_v35  ;;  %1315 = vmatpush.msra.mxu3 %v530_v36  ;;  %v547_v35 = vld [vmem:[%s3632_s1 + $0xe50] sm:$0xff] }
  0xeb   :  { %1248 = vmatpush.msra.mxu0 %v480_v37  ;;  %1271 = vmatpush.msra.mxu1 %v496_v38  ;;  %v563_v36 = vld [vmem:[%s3632_s1 + $0xed0] sm:$0xff]  ;;  %v596_v38 = vld [vmem:[%s3632_s1 + $0xfd8] sm:$0xff] }
  0xec   :  { %1294 = vmatpush.msra.mxu2 %v512_v39  ;;  %1316 = vmatpush.msra.mxu3 %v529_v40  ;;  %v579_v37 = vld [vmem:[%s3632_s1 + $0xf50] sm:$0xff]  ;;  %v546_v39 = vld [vmem:[%s3632_s1 + $0xe48] sm:$0xff] }
  0xed   :  { %1249 = vmatpush.msra.mxu0 %v479_v41  ;;  %1272 = vmatpush.msra.mxu1 %v495_v42  ;;  %v562_v40 = vld [vmem:[%s3632_s1 + $0xec8] sm:$0xff]  ;;  %v595_v42 = vld [vmem:[%s3632_s1 + $0xfd0] sm:$0xff] }
  0xee   :  { %1295 = vmatpush.msra.mxu2 %v511_v43  ;;  %1317 = vmatpush.msra.mxu3 %v528_v44  ;;  %v578_v41 = vld [vmem:[%s3632_s1 + $0xf48] sm:$0xff]  ;;  %v545_v43 = vld [vmem:[%s3632_s1 + $0xe40] sm:$0xff] }
  0xef   :  { %1250 = vmatpush.msra.mxu0 %v478_v45  ;;  %1273 = vmatpush.msra.mxu1 %v494_v46  ;;  %v561_v44 = vld [vmem:[%s3632_s1 + $0xec0] sm:$0xff]  ;;  %v594_v46 = vld [vmem:[%s3632_s1 + $0xfc8] sm:$0xff] }
  0xf0   :  { %1296 = vmatpush.msra.mxu2 %v510_v47  ;;  %1318 = vmatpush.msra.mxu3 %v527_v48  ;;  %v577_v45 = vld [vmem:[%s3632_s1 + $0xf40] sm:$0xff]  ;;  %v544_v47 = vld [vmem:[%s3632_s1 + $0xe38] sm:$0xff] }
  0xf1   :  { %1251 = vmatpush.msra.mxu0 %v477_v50  ;;  %1274 = vmatpush.msra.mxu1 %v493_v51  ;;  %v560_v48 = vld [vmem:[%s3632_s1 + $0xeb8] sm:$0xff]  ;;  %v593_v51 = vld [vmem:[%s3632_s1 + $0xfc0] sm:$0xff] }
  0xf2   :  { %1297 = vmatpush.msra.mxu2 %v509_v52  ;;  %1319 = vmatpush.msra.mxu3 %v526_v53  ;;  %v576_v50 = vld [vmem:[%s3632_s1 + $0xf38] sm:$0xff]  ;;  %v543_v52 = vld [vmem:[%s3632_s1 + $0xe30] sm:$0xff] }
  0xf3   :  { %1252 = vmatpush.msra.mxu0 %v476_v54  ;;  %1275 = vmatpush.msra.mxu1 %v492_v55  ;;  %v559_v53 = vld [vmem:[%s3632_s1 + $0xeb0] sm:$0xff]  ;;  %v592_v55 = vld [vmem:[%s3632_s1 + $0xfb8] sm:$0xff] }
  0xf4   :  { %1298 = vmatpush.msra.mxu2 %v508_v56  ;;  %1320 = vmatpush.msra.mxu3 %v525_v57  ;;  %v575_v54 = vld [vmem:[%s3632_s1 + $0xf30] sm:$0xff]  ;;  %v542_v56 = vld [vmem:[%s3632_s1 + $0xe28] sm:$0xff] }
  0xf5   :  { %1253 = vmatpush.msra.mxu0 %v475_v58  ;;  %1276 = vmatpush.msra.mxu1 %v491_v59  ;;  %v558_v57 = vld [vmem:[%s3632_s1 + $0xea8] sm:$0xff]  ;;  %v591_v59 = vld [vmem:[%s3632_s1 + $0xfb0] sm:$0xff] }
  0xf6   :  { %1299 = vmatpush.msra.mxu2 %v507_v60  ;;  %1321 = vmatpush.msra.mxu3 %v524_v61  ;;  %v574_v58 = vld [vmem:[%s3632_s1 + $0xf28] sm:$0xff]  ;;  %v541_v60 = vld [vmem:[%s3632_s1 + $0xe20] sm:$0xff] }
  0xf7   :  { %1254 = vmatpush.msra.mxu0 %v474_v62  ;;  %1277 = vmatpush.msra.mxu1 %v490_v63  ;;  %v557_v61 = vld [vmem:[%s3632_s1 + $0xea0] sm:$0xff]  ;;  %v590_v63 = vld [vmem:[%s3632_s1 + $0xfa8] sm:$0xff] }
  0xf8   :  { %1300 = vmatpush.msra.mxu2 %v506_v0  ;;  %1322 = vmatpush.msra.mxu3 %v523_v1  ;;  %v573_v62 = vld [vmem:[%s3632_s1 + $0xf20] sm:$0xff]  ;;  %v540_v0 = vld [vmem:[%s3632_s1 + $0xe18] sm:$0xff] }
  0xf9   :  { %1255 = vmatpush.msra.mxu0 %v473_v2  ;;  %1278 = vmatpush.msra.mxu1 %v489_v3  ;;  %v556_v1 = vld [vmem:[%s3632_s1 + $0xe98] sm:$0xff]  ;;  %v589_v3 = vld [vmem:[%s3632_s1 + $0xfa0] sm:$0xff] }
  0xfa   :  { %1301 = vmatpush.msra.mxu2 %v505_v4  ;;  %1323 = vmatpush.msra.mxu3 %v522_v5  ;;  %v572_v2 = vld [vmem:[%s3632_s1 + $0xf18] sm:$0xff]  ;;  %v539_v4 = vld [vmem:[%s3632_s1 + $0xe10] sm:$0xff] }
  0xfb   :  { %1256 = vmatmul.f32.vlgmr.msra.gmra.mxu0 %v39_v6  ;;  %1302 = vmatmul.f32.vlgmr.msra.gmra.mxu2 %v41_v7  ;;  %v555_v5 = vld [vmem:[%s3632_s1 + $0xe90] sm:$0xff]  ;;  %v588_v7 = vld [vmem:[%s3632_s1 + $0xf98] sm:$0xff] }
  0xfc   :  { %1332 = vmatpush.msrb.mxu0 %v552_v8  ;;  %1355 = vmatpush.msrb.mxu1 %v568_v9  ;;  %v571_v6 = vld [vmem:[%s3632_s1 + $0xf10] sm:$0xff]  ;;  %v538_v8 = vld [vmem:[%s3632_s1 + $0xe08] sm:$0xff] }
  0xfd   :  { %1378 = vmatpush.msrb.mxu2 %v584_v10  ;;  %1324 = vmatpush.msra.mxu3 %v521_v11  ;;  %v554_v9 = vld [vmem:[%s3632_s1 + $0xe88] sm:$0xff]  ;;  %v587_v11 = vld [vmem:[%s3632_s1 + $0xf90] sm:$0xff] }
  0xfe   :  { %1279 = vmatmul.f32.vlgmr.msra.gmra.mxu1 %v40_v12  ;;  %1325 = vmatmul.f32.vlgmr.msra.gmra.mxu3 %v42_v13  ;;  %v570_v10 = vld [vmem:[%s3632_s1 + $0xf08] sm:$0xff]  ;;  %v537_v12 = vld [vmem:[%s3632_s1 + $0xe00] sm:$0xff] }
  0xff   :  { %1333 = vmatpush.msrb.mxu0 %v551_v14  ;;  %1356 = vmatpush.msrb.mxu1 %v567_v15  ;;  %v553_v13 = vld [vmem:[%s3632_s1 + $0xe80] sm:$0xff]  ;;  %v586_v15 = vld [vmem:[%s3632_s1 + $0xf88] sm:$0xff] }
 0x100   :  { %1379 = vmatpush.msrb.mxu2 %v583_v16  ;;  %1401 = vmatpush.msrb.mxu3 %v600_v17  ;;  %v569_v14 = vld [vmem:[%s3632_s1 + $0xf00] sm:$0xff]  ;;  %v45_v17 = vld [vmem:[%s3631_s0 + $0xf0] sm:$0xff] }
 0x101   :  { %1334 = vmatpush.msrb.mxu0 %v550_v18  ;;  %1357 = vmatpush.msrb.mxu1 %v566_v19  ;;  %v43_v16 = vld [vmem:[%s3631_s0 + $0xe0] sm:$0xff]  ;;  %v616_v18 = vld [vmem:[%s3632_s1 + $0x1078] sm:$0xff] }
 0x102   :  { %1380 = vmatpush.msrb.mxu2 %v582_v20  ;;  %1402 = vmatpush.msrb.mxu3 %v599_v21  ;;  %v632_v19 = vld [vmem:[%s3632_s1 + $0x10f8] sm:$0xff]  ;;  %v585_v21 = vld [vmem:[%s3632_s1 + $0xf80] sm:$0xff] }
 0x103   :  { %1335 = vmatpush.msrb.mxu0 %v549_v22  ;;  %1358 = vmatpush.msrb.mxu1 %v565_v23  ;;  %v648_v20 = vld [vmem:[%s3632_s1 + $0x1178] sm:$0xff]  ;;  %v44_v22 = vld [vmem:[%s3631_s0 + $0xe8] sm:$0xff] }
 0x104   :  { %1381 = vmatpush.msrb.mxu2 %v581_v24  ;;  %1403 = vmatpush.msrb.mxu3 %v598_v25  ;;  %v46_v23 = vld [vmem:[%s3631_s0 + $0xf8] sm:$0xff]  ;;  %v615_v24 = vld [vmem:[%s3632_s1 + $0x1070] sm:$0xff] }
 0x105   :  { %1259 = vmatmul.f32.gmra.mxu0 %v76_v26  ;;  %1305 = vmatmul.f32.gmra.mxu2 %v78_v27  ;;  %v631_v25 = vld [vmem:[%s3632_s1 + $0x10f0] sm:$0xff]  ;;  %v664_v27 = vld [vmem:[%s3632_s1 + $0x11f8] sm:$0xff] }
 0x106   :  { %1336 = vmatpush.msrb.mxu0 %v548_v28  ;;  %1359 = vmatpush.msrb.mxu1 %v564_v29  ;;  %v647_v26 = vld [vmem:[%s3632_s1 + $0x1170] sm:$0xff]  ;;  %v614_v28 = vld [vmem:[%s3632_s1 + $0x1068] sm:$0xff] }
 0x107   :  { %1382 = vmatpush.msrb.mxu2 %v580_v30  ;;  %1404 = vmatpush.msrb.mxu3 %v597_v31  ;;  %v630_v29 = vld [vmem:[%s3632_s1 + $0x10e8] sm:$0xff]  ;;  %v663_v31 = vld [vmem:[%s3632_s1 + $0x11f0] sm:$0xff] }
 0x108   :  { %1282 = vmatmul.f32.gmra.mxu1 %v77_v32  ;;  %1328 = vmatmul.f32.gmra.mxu3 %v79_v34  ;;  %v646_v30 = vld [vmem:[%s3632_s1 + $0x1168] sm:$0xff]  ;;  %v613_v32 = vld [vmem:[%s3632_s1 + $0x1060] sm:$0xff] }
 0x109   :  { %1337 = vmatpush.msrb.mxu0 %v547_v35  ;;  %1360 = vmatpush.msrb.mxu1 %v563_v36  ;;  %v629_v34 = vld [vmem:[%s3632_s1 + $0x10e0] sm:$0xff]  ;;  %v662_v36 = vld [vmem:[%s3632_s1 + $0x11e8] sm:$0xff] }
 0x10a   :  { %1383 = vmatpush.msrb.mxu2 %v579_v37  ;;  %1405 = vmatpush.msrb.mxu3 %v596_v38  ;;  %v645_v35 = vld [vmem:[%s3632_s1 + $0x1160] sm:$0xff]  ;;  %v80_v37 = vld [vmem:[%s3631_s0 + $0x208] sm:$0xff]  ;;  %v82_v38 = vld [vmem:[%s3631_s0 + $0x218] sm:$0xff] }
 0x10b   :  { %1338 = vmatpush.msrb.mxu0 %v546_v39  ;;  %1361 = vmatpush.msrb.mxu1 %v562_v40  ;;  %v612_v39 = vld [vmem:[%s3632_s1 + $0x1058] sm:$0xff] }
 0x10c   :  { %1384 = vmatpush.msrb.mxu2 %v578_v41  ;;  %1406 = vmatpush.msrb.mxu3 %v595_v42  ;;  %v628_v40 = vld [vmem:[%s3632_s1 + $0x10d8] sm:$0xff]  ;;  %v661_v42 = vld [vmem:[%s3632_s1 + $0x11e0] sm:$0xff] }
 0x10d   :  { %1339 = vmatpush.msrb.mxu0 %v545_v43  ;;  %1362 = vmatpush.msrb.mxu1 %v561_v44  ;;  %v644_v41 = vld [vmem:[%s3632_s1 + $0x1158] sm:$0xff]  ;;  %v81_v43 = vld [vmem:[%s3631_s0 + $0x210] sm:$0xff]  ;;  %v83_v44 = vld [vmem:[%s3631_s0 + $0x220] sm:$0xff] }
 0x10e   :  { %1385 = vmatpush.msrb.mxu2 %v577_v45  ;;  %1407 = vmatpush.msrb.mxu3 %v594_v46  ;;  %v611_v45 = vld [vmem:[%s3632_s1 + $0x1050] sm:$0xff] }
 0x10f   :  { %1340 = vmatpush.msrb.mxu0 %v544_v47  ;;  %1363 = vmatpush.msrb.mxu1 %v560_v48  ;;  %v627_v46 = vld [vmem:[%s3632_s1 + $0x10d0] sm:$0xff]  ;;  %v660_v48 = vld [vmem:[%s3632_s1 + $0x11d8] sm:$0xff] }
 0x110   :  { %1386 = vmatpush.msrb.mxu2 %v576_v50  ;;  %1408 = vmatpush.msrb.mxu3 %v593_v51  ;;  %v643_v47 = vld [vmem:[%s3632_s1 + $0x1150] sm:$0xff]  ;;  %v610_v50 = vld [vmem:[%s3632_s1 + $0x1048] sm:$0xff] }
 0x111   :  { %1341 = vmatpush.msrb.mxu0 %v543_v52  ;;  %1364 = vmatpush.msrb.mxu1 %v559_v53  ;;  %v626_v51 = vld [vmem:[%s3632_s1 + $0x10c8] sm:$0xff]  ;;  %v659_v53 = vld [vmem:[%s3632_s1 + $0x11d0] sm:$0xff] }
 0x112   :  { %1387 = vmatpush.msrb.mxu2 %v575_v54  ;;  %1409 = vmatpush.msrb.mxu3 %v592_v55  ;;  %v642_v52 = vld [vmem:[%s3632_s1 + $0x1148] sm:$0xff]  ;;  %v609_v54 = vld [vmem:[%s3632_s1 + $0x1040] sm:$0xff] }
 0x113   :  { %1342 = vmatpush.msrb.mxu0 %v542_v56  ;;  %1365 = vmatpush.msrb.mxu1 %v558_v57  ;;  %v625_v55 = vld [vmem:[%s3632_s1 + $0x10c0] sm:$0xff]  ;;  %v658_v57 = vld [vmem:[%s3632_s1 + $0x11c8] sm:$0xff] }
 0x114   :  { %1388 = vmatpush.msrb.mxu2 %v574_v58  ;;  %1410 = vmatpush.msrb.mxu3 %v591_v59  ;;  %v641_v56 = vld [vmem:[%s3632_s1 + $0x1140] sm:$0xff]  ;;  %v608_v58 = vld [vmem:[%s3632_s1 + $0x1038] sm:$0xff] }
 0x115   :  { %1343 = vmatpush.msrb.mxu0 %v541_v60  ;;  %1366 = vmatpush.msrb.mxu1 %v557_v61  ;;  %v624_v59 = vld [vmem:[%s3632_s1 + $0x10b8] sm:$0xff]  ;;  %v657_v61 = vld [vmem:[%s3632_s1 + $0x11c0] sm:$0xff] }
 0x116   :  { %1389 = vmatpush.msrb.mxu2 %v573_v62  ;;  %1411 = vmatpush.msrb.mxu3 %v590_v63  ;;  %v640_v60 = vld [vmem:[%s3632_s1 + $0x1138] sm:$0xff]  ;;  %v607_v62 = vld [vmem:[%s3632_s1 + $0x1030] sm:$0xff] }
 0x117   :  { %1344 = vmatpush.msrb.mxu0 %v540_v0  ;;  %1367 = vmatpush.msrb.mxu1 %v556_v1  ;;  %v623_v63 = vld [vmem:[%s3632_s1 + $0x10b0] sm:$0xff]  ;;  %v656_v1 = vld [vmem:[%s3632_s1 + $0x11b8] sm:$0xff] }
 0x118   :  { %1390 = vmatpush.msrb.mxu2 %v572_v2  ;;  %1412 = vmatpush.msrb.mxu3 %v589_v3  ;;  %v639_v0 = vld [vmem:[%s3632_s1 + $0x1130] sm:$0xff]  ;;  %v606_v2 = vld [vmem:[%s3632_s1 + $0x1028] sm:$0xff] }
 0x119   :  { %1345 = vmatpush.msrb.mxu0 %v539_v4  ;;  %1368 = vmatpush.msrb.mxu1 %v555_v5  ;;  %v622_v3 = vld [vmem:[%s3632_s1 + $0x10a8] sm:$0xff]  ;;  %v655_v5 = vld [vmem:[%s3632_s1 + $0x11b0] sm:$0xff] }
 0x11a   :  { %1391 = vmatpush.msrb.mxu2 %v571_v6  ;;  %1413 = vmatpush.msrb.mxu3 %v588_v7  ;;  %v638_v4 = vld [vmem:[%s3632_s1 + $0x1128] sm:$0xff]  ;;  %v605_v6 = vld [vmem:[%s3632_s1 + $0x1020] sm:$0xff] }
 0x11b   :  { %1346 = vmatpush.msrb.mxu0 %v538_v8  ;;  %1369 = vmatpush.msrb.mxu1 %v554_v9  ;;  %v621_v7 = vld [vmem:[%s3632_s1 + $0x10a0] sm:$0xff]  ;;  %v654_v9 = vld [vmem:[%s3632_s1 + $0x11a8] sm:$0xff] }
 0x11c   :  { %1392 = vmatpush.msrb.mxu2 %v570_v10  ;;  %1414 = vmatpush.msrb.mxu3 %v587_v11  ;;  %v637_v8 = vld [vmem:[%s3632_s1 + $0x1120] sm:$0xff]  ;;  %v604_v10 = vld [vmem:[%s3632_s1 + $0x1018] sm:$0xff] }
 0x11d   :  { %1347 = vmatpush.msrb.mxu0 %v537_v12  ;;  %1370 = vmatpush.msrb.mxu1 %v553_v13  ;;  %v620_v11 = vld [vmem:[%s3632_s1 + $0x1098] sm:$0xff]  ;;  %v653_v13 = vld [vmem:[%s3632_s1 + $0x11a0] sm:$0xff] }
 0x11e   :  { %1393 = vmatpush.msrb.mxu2 %v569_v14  ;;  %1415 = vmatpush.msrb.mxu3 %v586_v15  ;;  %v636_v12 = vld [vmem:[%s3632_s1 + $0x1118] sm:$0xff]  ;;  %v603_v14 = vld [vmem:[%s3632_s1 + $0x1010] sm:$0xff] }
 0x11f   :  { %1348 = vmatmul.f32.vlgmr.msrb.gmra.mxu0 %v43_v16  ;;  %1394 = vmatmul.f32.vlgmr.msrb.gmra.mxu2 %v45_v17  ;;  %v619_v15 = vld [vmem:[%s3632_s1 + $0x1090] sm:$0xff]  ;;  %v652_v17 = vld [vmem:[%s3632_s1 + $0x1198] sm:$0xff] }
 0x120   :  { %1424 = vmatpush.msra.mxu0 %v616_v18  ;;  %1447 = vmatpush.msra.mxu1 %v632_v19  ;;  %v635_v16 = vld [vmem:[%s3632_s1 + $0x1110] sm:$0xff]  ;;  %v602_v18 = vld [vmem:[%s3632_s1 + $0x1008] sm:$0xff] }
 0x121   :  { %1470 = vmatpush.msra.mxu2 %v648_v20  ;;  %1416 = vmatpush.msrb.mxu3 %v585_v21  ;;  %v618_v19 = vld [vmem:[%s3632_s1 + $0x1088] sm:$0xff]  ;;  %v651_v21 = vld [vmem:[%s3632_s1 + $0x1190] sm:$0xff] }
 0x122   :  { %1371 = vmatmul.f32.vlgmr.msrb.gmra.mxu1 %v44_v22  ;;  %1417 = vmatmul.f32.vlgmr.msrb.gmra.mxu3 %v46_v23  ;;  %v634_v20 = vld [vmem:[%s3632_s1 + $0x1108] sm:$0xff]  ;;  %v601_v22 = vld [vmem:[%s3632_s1 + $0x1000] sm:$0xff] }
 0x123   :  { %1425 = vmatpush.msra.mxu0 %v615_v24  ;;  %1448 = vmatpush.msra.mxu1 %v631_v25  ;;  %v617_v23 = vld [vmem:[%s3632_s1 + $0x1080] sm:$0xff]  ;;  %v650_v25 = vld [vmem:[%s3632_s1 + $0x1188] sm:$0xff] }
 0x124   :  { %1471 = vmatpush.msra.mxu2 %v647_v26  ;;  %1493 = vmatpush.msra.mxu3 %v664_v27  ;;  %v633_v24 = vld [vmem:[%s3632_s1 + $0x1100] sm:$0xff]  ;;  %v49_v27 = vld [vmem:[%s3631_s0 + $0x110] sm:$0xff] }
 0x125   :  { %1426 = vmatpush.msra.mxu0 %v614_v28  ;;  %1449 = vmatpush.msra.mxu1 %v630_v29  ;;  %v47_v26 = vld [vmem:[%s3631_s0 + $0x100] sm:$0xff]  ;;  %v676_v28 = vld [vmem:[%s3632_s1 + $0x1258] sm:$0xff] }
 0x126   :  { %1472 = vmatpush.msra.mxu2 %v646_v30  ;;  %1494 = vmatpush.msra.mxu3 %v663_v31  ;;  %v649_v29 = vld [vmem:[%s3632_s1 + $0x1180] sm:$0xff]  ;;  %v48_v30 = vld [vmem:[%s3631_s0 + $0x108] sm:$0xff]  ;;  %v50_v31 = vld [vmem:[%s3631_s0 + $0x118] sm:$0xff] }
 0x127   :  { %1427 = vmatpush.msra.mxu0 %v613_v32  ;;  %1450 = vmatpush.msra.mxu1 %v629_v34  ;;  %v675_v32 = vld [vmem:[%s3632_s1 + $0x1250] sm:$0xff]  ;;  %v674_v34 = vld [vmem:[%s3632_s1 + $0x1248] sm:$0xff] }
 0x128   :  { %1473 = vmatpush.msra.mxu2 %v645_v35  ;;  %1495 = vmatpush.msra.mxu3 %v662_v36  ;;  %v673_v35 = vld [vmem:[%s3632_s1 + $0x1240] sm:$0xff]  ;;  %v84_v36 = vld [vmem:[%s3631_s0 + $0x228] sm:$0xff] }
 0x129   :  { %1351 = vmatmul.f32.gmra.mxu0 %v80_v37  ;;  %1397 = vmatmul.f32.gmra.mxu2 %v82_v38  ;;  %v3584_v37 = vpop.f32.mrf.mxu2  ;;  %v86_v38 = vld [vmem:[%s3631_s0 + $0x238] sm:$0xff] }
 0x12a   :  { %1428 = vmatpush.msra.mxu0 %v612_v39  ;;  %1451 = vmatpush.msra.mxu1 %v628_v40  ;;  %v672_v39 = vld [vmem:[%s3632_s1 + $0x1238] sm:$0xff]  ;;  %v800_v40 = vpop.f32.mrf.mxu0 }
 0x12b   :  { %1474 = vmatpush.msra.mxu2 %v644_v41  ;;  %1496 = vmatpush.msra.mxu3 %v661_v42  ;;  %v85_v41 = vld [vmem:[%s3631_s0 + $0x230] sm:$0xff]  ;;  %v87_v42 = vld [vmem:[%s3631_s0 + $0x240] sm:$0xff] }
 0x12c   :  { %1374 = vmatmul.f32.gmra.mxu1 %v81_v43  ;;  %1420 = vmatmul.f32.gmra.mxu3 %v83_v44  ;;  %v671_v43 = vld [vmem:[%s3632_s1 + $0x1230] sm:$0xff]  ;;  %v866_v44 = vpop.f32.mrf.mxu3 }
 0x12d   :  { %1429 = vmatpush.msra.mxu0 %v611_v45  ;;  %1452 = vmatpush.msra.mxu1 %v627_v46  ;;  %v670_v45 = vld [vmem:[%s3632_s1 + $0x1228] sm:$0xff]  ;;  %v823_v46 = vpop.f32.mrf.mxu1 }
 0x12e   :  { %1475 = vmatpush.msra.mxu2 %v643_v47  ;;  %1497 = vmatpush.msra.mxu3 %v660_v48  ;;  %v669_v47 = vld [vmem:[%s3632_s1 + $0x1220] sm:$0xff] }
 0x12f   :  { %1430 = vmatpush.msra.mxu0 %v610_v50  ;;  %1453 = vmatpush.msra.mxu1 %v626_v51  ;;  %v668_v50 = vld [vmem:[%s3632_s1 + $0x1218] sm:$0xff]  ;;  %v667_v51 = vld [vmem:[%s3632_s1 + $0x1210] sm:$0xff] }
 0x130   :  { %1476 = vmatpush.msra.mxu2 %v642_v52  ;;  %1498 = vmatpush.msra.mxu3 %v659_v53 }
 0x131   :  { %1431 = vmatpush.msra.mxu0 %v609_v54  ;;  %1454 = vmatpush.msra.mxu1 %v625_v55  ;;  %v846_v48 = vpop.f32.mrf.mxu2  ;;  %v666_v54 = vld [vmem:[%s3632_s1 + $0x1208] sm:$0xff]  ;;  %v665_v55 = vld [vmem:[%s3632_s1 + $0x1200] sm:$0xff] }
 0x132   :  { %1477 = vmatpush.msra.mxu2 %v641_v56  ;;  %1499 = vmatpush.msra.mxu3 %v658_v57  ;;  %v889_v53 = vpop.f32.mrf.mxu0  ;;  %v51_v57 = vld [vmem:[%s3631_s0 + $0x120] sm:$0xff] }
 0x133   :  { %1432 = vmatpush.msra.mxu0 %v608_v58  ;;  %1455 = vmatpush.msra.mxu1 %v624_v59  ;;  %v88_v58 = vld [vmem:[%s3631_s0 + $0x248] sm:$0xff]  ;;  %s1603_s0 = smov [#allocation2]  }
 0x134   :  { %1478 = vmatpush.msra.mxu2 %v640_v60  ;;  %1500 = vmatpush.msra.mxu3 %v657_v61  ;;  %v869_v52 = vpop.f32.mrf.mxu3  ;;  %s1545_s1 = sshll.u32 %s1603_s0, 4  ;;  %s1546_s1 = int_to_ptr.vmem [resolvable:$true] %s1545_s1 }
 0x135   :  { %1433 = vmatpush.msra.mxu0 %v607_v62  ;;  %1456 = vmatpush.msra.mxu1 %v623_v63  ;;  %v912_v56 = vpop.f32.mrf.mxu1 }
 0x136   :  { %1479 = vmatpush.msra.mxu2 %v639_v0  ;;  %1501 = vmatpush.msra.mxu3 %v656_v1 }
 0x137   :  { %1434 = vmatpush.msra.mxu0 %v606_v2  ;;  %1457 = vmatpush.msra.mxu1 %v622_v3 }
 0x138   :  { %1480 = vmatpush.msra.mxu2 %v638_v4  ;;  %1502 = vmatpush.msra.mxu3 %v655_v5 }
 0x139   :  { %1435 = vmatpush.msra.mxu0 %v605_v6  ;;  %1458 = vmatpush.msra.mxu1 %v621_v7  ;;  %v935_v59 = vpop.f32.mrf.mxu2 }
 0x13a   :  { %1481 = vmatpush.msra.mxu2 %v637_v8  ;;  %1503 = vmatpush.msra.mxu3 %v654_v9  ;;  %v892_v60 = vpop.f32.mrf.mxu0  ;;  %v801_v8 = vadd.f32 %v800_v40, %v2836_v33 }
 0x13b   :  { %1436 = vmatpush.msra.mxu0 %v604_v10  ;;  %1459 = vmatpush.msra.mxu1 %v620_v11 }
 0x13c   :  { %1482 = vmatpush.msra.mxu2 %v636_v12  ;;  %1504 = vmatpush.msra.mxu3 %v653_v13  ;;  %v958_v61 = vpop.f32.mrf.mxu3  ;;  %v824_v11 = vadd.f32 %v823_v46, %v801_v8 }
 0x13d   :  { %1437 = vmatpush.msra.mxu0 %v603_v14  ;;  %1460 = vmatpush.msra.mxu1 %v619_v15  ;;  %v915_v62 = vpop.f32.mrf.mxu1  ;;  %v844_v14 = vadd.f32 %v3584_v37, %v2874_v49 }
 0x13e   :  { %1483 = vmatpush.msra.mxu2 %v635_v16  ;;  %1505 = vmatpush.msra.mxu3 %v652_v17  ;;  %v847_v15 = vadd.f32 %v846_v48, %v824_v11 }
 0x13f   :  { %1438 = vmatpush.msra.mxu0 %v602_v18  ;;  %1461 = vmatpush.msra.mxu1 %v618_v19  ;;  %v867_v18 = vadd.f32 %v866_v44, %v844_v14 }
 0x140   :  { %1484 = vmatpush.msra.mxu2 %v634_v20  ;;  %1506 = vmatpush.msra.mxu3 %v651_v21  ;;  %v870_v19 = vadd.f32 %v869_v52, %v847_v15 }
 0x141   :  { %1439 = vmatpush.msra.mxu0 %v601_v22  ;;  %1462 = vmatpush.msra.mxu1 %v617_v23  ;;  %v938_v63 = vpop.f32.mrf.mxu2  ;;  %v890_v20 = vadd.f32 %v889_v53, %v867_v18 }
 0x142   :  { %1485 = vmatpush.msra.mxu2 %v633_v24  ;;  %1507 = vmatpush.msra.mxu3 %v650_v25  ;;  %v981_v0 = vpop.f32.mrf.mxu0  ;;  %v893_v21 = vadd.f32 %v892_v60, %v870_v19 }
 0x143   :  { %1440 = vmatmul.f32.vlgmr.msra.gmra.mxu0 %v47_v26  ;;  %1486 = vmatmul.f32.vlgmr.msra.gmra.mxu2 %v49_v27  ;;  %v913_v24 = vadd.f32 %v912_v56, %v890_v20 }
 0x144   :  { %1520 = vmatpush.msrb.mxu0 %v676_v28  ;;  %1561 = vmatpush.msrb.mxu1 %v676_v28  ;;  %v961_v1 = vpop.f32.mrf.mxu3  ;;  %v916_v25 = vadd.f32 %v915_v62, %v893_v21 }
 0x145   :  { %1508 = vmatpush.msra.mxu3 %v649_v29  ;;  %1463 = vmatmul.f32.vlgmr.msra.gmra.mxu1 %v48_v30  ;;  %v1004_v2 = vpop.f32.mrf.mxu1  ;;  %v936_v26 = vadd.f32 %v935_v59, %v913_v24 }
 0x146   :  { %1509 = vmatmul.f32.vlgmr.msra.gmra.mxu3 %v50_v31  ;;  %1521 = vmatpush.msrb.mxu0 %v675_v32  ;;  %v939_v27 = vadd.f32 %v938_v63, %v916_v25 }
 0x147   :  { %1562 = vmatpush.msrb.mxu1 %v675_v32  ;;  %v959_v30 = vadd.f32 %v958_v61, %v936_v26 }
 0x148   :  { %1522 = vmatpush.msrb.mxu0 %v674_v34  ;;  %v962_v31 = vadd.f32 %v961_v1, %v939_v27 }
 0x149   :  { %1563 = vmatpush.msrb.mxu1 %v674_v34  ;;  %v1027_v3 = vpop.f32.mrf.mxu2  ;;  %v982_v49 = vadd.f32 %v981_v0, %v959_v30 }
 0x14a   :  { %1523 = vmatpush.msrb.mxu0 %v673_v35  ;;  %v984_v4 = vpop.f32.mrf.mxu0 }
 0x14b   :  { %1564 = vmatpush.msrb.mxu1 %v673_v35  ;;  %1443 = vmatmul.f32.gmra.mxu0 %v84_v36  ;;  %v985_v34 = vadd.f32 %v984_v4, %v962_v31  ;;  %v1005_v37 = vadd.f32 %v1004_v2, %v982_v49 }
 0x14c   :  { %1489 = vmatmul.f32.gmra.mxu2 %v86_v38  ;;  %1524 = vmatpush.msrb.mxu0 %v672_v39  ;;  %v1050_v5 = vpop.f32.mrf.mxu3 }
 0x14d   :  { %1565 = vmatpush.msrb.mxu1 %v672_v39  ;;  %v1007_v6 = vpop.f32.mrf.mxu1  ;;  %v1028_v39 = vadd.f32 %v1027_v3, %v1005_v37 }
 0x14e   :  { %1466 = vmatmul.f32.gmra.mxu1 %v85_v41  ;;  %1512 = vmatmul.f32.gmra.mxu3 %v87_v42  ;;  %v1008_v38 = vadd.f32 %v1007_v6, %v985_v34 }
 0x14f   :  { %1525 = vmatpush.msrb.mxu0 %v671_v43  ;;  %1566 = vmatpush.msrb.mxu1 %v671_v43  ;;  %v1051_v43 = vadd.f32 %v1050_v5, %v1028_v39 }
 0x151   :  { %1526 = vmatpush.msrb.mxu0 %v670_v45  ;;  %1567 = vmatpush.msrb.mxu1 %v670_v45  ;;  %v1030_v7 = vpop.f32.mrf.mxu2 }
 0x152   :  { %v1073_v9 = vpop.f32.mrf.mxu0  ;;  %v1031_v40 = vadd.f32 %v1030_v7, %v1008_v38 }
 0x153   :  { %1527 = vmatpush.msrb.mxu0 %v669_v47  ;;  %1568 = vmatpush.msrb.mxu1 %v669_v47  ;;  %v1074_v46 = vadd.f32 %v1073_v9, %v1051_v43 }
 0x154   :  { %v1053_v10 = vpop.f32.mrf.mxu3 }
 0x155   :  { %1528 = vmatpush.msrb.mxu0 %v668_v50  ;;  %1569 = vmatpush.msrb.mxu1 %v668_v50  ;;  %v1096_v12 = vpop.f32.mrf.mxu1  ;;  %v1054_v44 = vadd.f32 %v1053_v10, %v1031_v40 }
 0x157   :  { %1529 = vmatpush.msrb.mxu0 %v667_v51  ;;  %1570 = vmatpush.msrb.mxu1 %v667_v51  ;;  %v1097_v51 = vadd.f32 %v1096_v12, %v1074_v46 }
 0x159   :  { %1530 = vmatpush.msrb.mxu0 %v666_v54  ;;  %1571 = vmatpush.msrb.mxu1 %v666_v54  ;;  %v1119_v13 = vpop.f32.mrf.mxu2 }
 0x15a   :  { %v1076_v16 = vpop.f32.mrf.mxu0  ;;  %v1120_v54 = vadd.f32 %v1119_v13, %v1097_v51 }
 0x15b   :  { %1531 = vmatpush.msrb.mxu0 %v665_v55  ;;  %1572 = vmatpush.msrb.mxu1 %v665_v55  ;;  %v1077_v47 = vadd.f32 %v1076_v16, %v1054_v44 }
 0x15c   :  { %1559 = vmatmul.msk.f32.vlgmr.msrb.gmra.mxu0 %vm681_vm0, %v51_v57  ;;  %1560 = vmatmul.msk.f32.vlgmr.msrb.gmra.mxu1 %vm681_vm0, %v88_v58  ;;  %v1142_v17 = vpop.f32.mrf.mxu3 }
 0x15d   :  { %v1099_v22 = vpop.f32.mrf.mxu1  ;;  %v1143_v58 = vadd.f32 %v1142_v17, %v1120_v54 }
 0x15e   :  { %v1100_v52 = vadd.f32 %v1099_v22, %v1077_v47 }
 0x161   :  { %v1122_v23 = vpop.f32.mrf.mxu2 }
 0x162   :  { %v1165_v33 = vpop.f32.mrf.mxu0  ;;  %v1123_v55 = vadd.f32 %v1122_v23, %v1100_v52 }
 0x163   :  { %v1166_v60 = vadd.f32 %v1165_v33, %v1143_v58 }
 0x164   :  { %v1145_v28 = vpop.f32.mrf.mxu3 }
 0x165   :  { %v1188_v29 = vpop.f32.mrf.mxu1  ;;  %v1146_v59 = vadd.f32 %v1145_v28, %v1123_v55 }
 0x166   :  { %v1189_v0 = vadd.f32 %v1188_v29, %v1166_v60 }
 0x169   :  { %v1211_v32 = vpop.f32.mrf.mxu2 }
 0x16a   :  { %v1168_v35 = vpop.f32.mrf.mxu0  ;;  %v1212_v3 = vadd.f32 %v1211_v32, %v1189_v0 }
 0x16b   :  { %v1169_v61 = vadd.f32 %v1168_v35, %v1146_v59 }
 0x16c   :  { %v1234_v36 = vpop.f32.mrf.mxu3 }
 0x16d   :  { %v1191_v41 = vpop.f32.mrf.mxu1  ;;  %v1235_v7 = vadd.f32 %v1234_v36, %v1212_v3 }
 0x16e   :  { %v1192_v1 = vadd.f32 %v1191_v41, %v1169_v61 }
 0x171   :  { %v1214_v42 = vpop.f32.mrf.mxu2 }
 0x172   :  { %v1215_v4 = vadd.f32 %v1214_v42, %v1192_v1 }
 0x174   :  { %v1237_v48 = vpop.f32.mrf.mxu3 }
 0x175   :  { %v1238_v8 = vadd.f32 %v1237_v48, %v1215_v4 }
 0x178   :  { %v1257_v45 = vpop.f32.mrf.mxu0 }
 0x179   :  { %v1258_v10 = vadd.f32 %v1257_v45, %v1235_v7 }
 0x17b   :  { %v1280_v50 = vpop.f32.mrf.mxu1 }
 0x17c   :  { %v1281_v14 = vadd.f32 %v1280_v50, %v1258_v10 }
 0x17e   :  { %v1303_v53 = vpop.f32.mrf.mxu2 }
 0x17f   :  { %v1304_v16 = vadd.f32 %v1303_v53, %v1281_v14 }
 0x181   :  { %v1326_v57 = vpop.f32.mrf.mxu3 }
 0x182   :  { %v1260_v56 = vpop.f32.mrf.mxu0  ;;  %v1327_v20 = vadd.f32 %v1326_v57, %v1304_v16 }
 0x183   :  { %v1261_v11 = vadd.f32 %v1260_v56, %v1238_v8 }
 0x185   :  { %v1283_v62 = vpop.f32.mrf.mxu1 }
 0x186   :  { %v1284_v15 = vadd.f32 %v1283_v62, %v1261_v11 }
 0x188   :  { %v1306_v63 = vpop.f32.mrf.mxu2 }
 0x189   :  { %v1307_v17 = vadd.f32 %v1306_v63, %v1284_v15 }
 0x18b   :  { %v1329_v5 = vpop.f32.mrf.mxu3 }
 0x18c   :  { %v1330_v21 = vadd.f32 %v1329_v5, %v1307_v17 }
 0x19c   :  { %v1349_v2 = vpop.f32.mrf.mxu0 }
 0x19d   :  { %v1350_v23 = vadd.f32 %v1349_v2, %v1327_v20 }
 0x19f   :  { %v1372_v6 = vpop.f32.mrf.mxu1 }
 0x1a0   :  { %v1373_v26 = vadd.f32 %v1372_v6, %v1350_v23 }
 0x1a2   :  { %v1395_v9 = vpop.f32.mrf.mxu2 }
 0x1a3   :  { %v1396_v29 = vadd.f32 %v1395_v9, %v1373_v26 }
 0x1a5   :  { %v1418_v13 = vpop.f32.mrf.mxu3 }
 0x1a6   :  { %v1352_v12 = vpop.f32.mrf.mxu0  ;;  %v1419_v49 = vadd.f32 %v1418_v13, %v1396_v29 }
 0x1a7   :  { %v1353_v24 = vadd.f32 %v1352_v12, %v1330_v21 }
 0x1a9   :  { %v1375_v18 = vpop.f32.mrf.mxu1 }
 0x1aa   :  { %v1376_v27 = vadd.f32 %v1375_v18, %v1353_v24 }
 0x1ac   :  { %v1398_v19 = vpop.f32.mrf.mxu2 }
 0x1ad   :  { %v1399_v30 = vadd.f32 %v1398_v19, %v1376_v27 }
 0x1af   :  { %v1421_v25 = vpop.f32.mrf.mxu3 }
 0x1b0   :  { %v1422_v34 = vadd.f32 %v1421_v25, %v1399_v30 }
 0x1c0   :  { %v1441_v22 = vpop.f32.mrf.mxu0 }
 0x1c1   :  { %v1442_v35 = vadd.f32 %v1441_v22, %v1419_v49 }
 0x1c2   :  { %v1464_v33 = vpop.f32.mrf.mxu1 }
 0x1c3   :  { %v1465_v39 = vadd.f32 %v1464_v33, %v1442_v35 }
 0x1c6   :  { %v1487_v28 = vpop.f32.mrf.mxu2 }
 0x1c7   :  { %v1488_v41 = vadd.f32 %v1487_v28, %v1465_v39 }
 0x1c8   :  { %v1444_v31 = vpop.f32.mrf.mxu0 }
 0x1c9   :  { %v1510_v32 = vpop.f32.mrf.mxu3  ;;  %v1445_v36 = vadd.f32 %v1444_v31, %v1422_v34 }
 0x1ca   :  { %v1511_v44 = vadd.f32 %v1510_v32, %v1488_v41 }
 0x1cb   :  { %v1467_v37 = vpop.f32.mrf.mxu1 }
 0x1cc   :  { %v1468_v40 = vadd.f32 %v1467_v37, %v1445_v36 }
 0x1cf   :  { %v1490_v38 = vpop.f32.mrf.mxu2 }
 0x1d0   :  { %v1491_v42 = vadd.f32 %v1490_v38, %v1468_v40 }
 0x1d1   :  { %v1513_v43 = vpop.f32.mrf.mxu3 }
 0x1d2   :  { %v1514_v45 = vadd.f32 %v1513_v43, %v1491_v42 }
 0x1d9   :  { %v1533_v46 = vpop.f32.mrf.mxu0  ;;  %v1536_v47 = vpop.f32.mrf.mxu1 }
 0x1da   :  { %v1534_v48 = vadd.f32 %v1533_v46, %v1511_v44  ;;  %v1537_v50 = vadd.f32 %v1536_v47, %v1514_v45 }
 0x1dc   :  { %1539 = vst [vmem:[#allocation2] sm:$0xff] %v1534_v48 }
 0x1dd   :  { %1540 = vst [vmem:[#allocation2 + $0x8] sm:$0xff] %v1537_v50 }
 0x1de   :  { %1553 = dma.vmem_to_hbm [thread:$0]  %s1546_s1, 256, %s1548_s22, [#allocation3], %s1604_s23, %s1604_s23, %s1605_s24  }
 0x1df   :  { %1601 = dma.done.wait [#allocation3], 256  }
 0x1e0   :  { %1602 = vsyncadd [#allocation3], 4294967040 }
 0x1e1   :  { %1558 = vsyncpa [#allocation3], 1 }

</bundles_post_ra>
